<compile_context>
chip_gen: v7x
topology: tpu7x:2x2x1
jax: 0.10.0
libtpu: 0.0.40
codegen_flags: <defaults>
</compile_context>

<pallas_src>
import jax
import jax.numpy as jnp
from jax.experimental import pallas as pl
from jax.experimental.pallas import tpu as pltpu


def _round_up(x, m):
    return ((x + m - 1) // m) * m


def prepare_params(raw, F, E, cat_sizes, H1, H2, D_out, weight_dtype=jnp.float32):
    """Pad / refactor torch-layout params into kernel-friendly constants."""
    FE = F * E
    C = sum(cat_sizes)
    FEp = _round_up(FE, 128)
    H1p = _round_up(H1, 128)
    H2p = _round_up(H2, 128)
    Dp = _round_up(D_out, 128)
    Cp = _round_up(C, 128)
    Wmax = max(FEp, H1p, H2p, Dp)

    # Selector with w_tok folded in: sel_scaled[f, f*E + e] = w_tok[f, e].
    sel01 = jnp.kron(jnp.eye(F, dtype=jnp.float32), jnp.ones((1, E), jnp.float32))
    sel_scaled = sel01 * raw["w_tok"].reshape(1, FE)
    sel_scaled = jnp.pad(sel_scaled, ((0, 0), (0, FEp - FE)))

    def padw(w, rows, cols):
        return jnp.pad(w, ((0, rows - w.shape[0]), (0, cols - w.shape[1])))

    w1a = padw(raw["w1"][:FE], FEp, H1p)   # acts on flattened numerical embeddings
    w1b = padw(raw["w1"][FE:], Cp, H1p)    # acts on the one-hot categorical block
    w2 = padw(raw["w2"], H1p, H2p)
    wh = padw(raw["wh"], H2p, Dp)

    biases = jnp.stack([
        jnp.pad(raw["b_tok"].reshape(-1), (0, Wmax - FE)),
        jnp.pad(raw["b1"], (0, Wmax - H1)),
        jnp.pad(raw["b2"], (0, Wmax - H2)),
        jnp.pad(raw["bh"], (0, Wmax - D_out)),
    ], axis=0).astype(jnp.float32)          # (4, Wmax), stays f32

    offsets = []
    acc = 0
    for cs in cat_sizes:
        offsets.append(acc)
        acc += cs

    wd = jnp.dtype(weight_dtype)
    return {
        "sel": sel_scaled.astype(wd),
        "w1a": w1a.astype(wd),
        "w1b": w1b.astype(wd),
        "w2": w2.astype(wd),
        "wh": wh.astype(wd),
        "biases": biases,
        "offsets": jnp.asarray(offsets, jnp.int32),
        "dims": dict(F=F, FE=FE, FEp=FEp, H1p=H1p, H2p=H2p, Dp=Dp,
                     C=C, Cp=Cp, Wmax=Wmax, D_out=D_out, n_cat=len(cat_sizes)),
    }


def flat_model_forward(x_num, x_cat_idx, kp, *, tb=128):
    dims = kp["dims"]
    B, F = x_num.shape
    n_cat = dims["n_cat"]
    FEp, H1p, H2p, Dp, Cp, Wmax = (dims[k] for k in
                                   ("FEp", "H1p", "H2p", "Dp", "Cp", "Wmax"))
    w_dtype = kp["sel"].dtype

    # Pad the batch so the grid covers every row (tail rows are zeros, sliced off).
    n_tiles = pl.cdiv(B, tb)
    B_pad = n_tiles * tb
    if B_pad != B:
        x_num = jnp.pad(x_num, ((0, B_pad - B), (0, 0)))
        x_cat_idx = jnp.pad(x_cat_idx, ((0, B_pad - B), (0, 0)))
    # Global (offset) category indices; only int32 indices hit HBM, never a one-hot.
    x_idx_global = (x_cat_idx + kp["offsets"][None, :]).astype(jnp.int32)

    def kernel(x_num_ref, x_idx_ref, sel_ref, w1a_ref, w1b_ref, w2_ref, wh_ref,
               bias_ref, out_ref):
        biases = bias_ref[...]                                   # (4, Wmax) f32

        # Tokenizer + ReLU (w_tok folded into sel):
        #   emb[b, f*E + e] = relu(x_num[b, f] * w_tok[f, e] + b_tok[f, e])
        emb = jnp.dot(x_num_ref[...].astype(w_dtype), sel_ref[...],
                      preferred_element_type=jnp.float32)
        emb = jnp.maximum(emb + biases[0:1, :FEp], 0.0)

        # Rebuild the one-hot tile in-register from int32 indices.
        idx = x_idx_ref[...]                                      # (tb, n_cat) i32
        lane = jax.lax.broadcasted_iota(jnp.int32, (tb, Cp), 1)
        onehot = jnp.zeros((tb, Cp), jnp.float32)
        for i in range(n_cat):                                    # small, static
            onehot = onehot + (lane == idx[:, i:i + 1]).astype(jnp.float32)

        # MLP block 1: relu(concat([emb, onehot]) @ W1 + b1), W1 split row-wise.
        h = jnp.dot(emb.astype(w_dtype), w1a_ref[...],
                    preferred_element_type=jnp.float32)
        h = h + jnp.dot(onehot.astype(w_dtype), w1b_ref[...],
                        preferred_element_type=jnp.float32)
        h = jnp.maximum(h + biases[1:2, :H1p], 0.0)

        # MLP block 2 (dropout p=0 -> identity).
        h = jnp.dot(h.astype(w_dtype), w2_ref[...],
                    preferred_element_type=jnp.float32)
        h = jnp.maximum(h + biases[2:3, :H2p], 0.0)

        # Head linear; lane-dense (tb, Dp) store, real D_out sliced outside.
        out = jnp.dot(h.astype(w_dtype), wh_ref[...],
                      preferred_element_type=jnp.float32)
        out_ref[...] = (out + biases[3:4, :Dp]).astype(out_ref.dtype)

    full = lambda arr: pl.BlockSpec(arr.shape, lambda i: (0, 0))

    w_bytes = jnp.dtype(w_dtype).itemsize
    weight_elems = (F * FEp + FEp * H1p + Cp * H1p + H1p * H2p + H2p * Dp)
    cost = pl.CostEstimate(
        flops=2 * B_pad * (F * FEp + FEp * H1p + Cp * H1p + H1p * H2p + H2p * Dp),
        transcendentals=0,
        bytes_accessed=(B_pad * F * 4 + B_pad * n_cat * 4 + B_pad * Dp * 4
                        + weight_elems * w_bytes + 4 * Wmax * 4),
    )

    out = pl.pallas_call(
        kernel,
        out_shape=jax.ShapeDtypeStruct((B_pad, Dp), jnp.float32),
        grid_spec=pltpu.PrefetchScalarGridSpec(
            num_scalar_prefetch=0,
            grid=(n_tiles,),
            in_specs=[
                pl.BlockSpec((tb, F), lambda i: (i, 0)),       # x_num tile
                pl.BlockSpec((tb, n_cat), lambda i: (i, 0)),   # category indices
                full(kp["sel"]),                               # tokenizer (folded)
                full(kp["w1a"]),                               # W1 (numerical rows)
                full(kp["w1b"]),                               # W1 (categorical rows)
                full(kp["w2"]),                                # W2
                full(kp["wh"]),                                # W_head
                full(kp["biases"]),                            # fused biases
            ],
            out_specs=pl.BlockSpec((tb, Dp), lambda i: (i, 0)),
        ),
        compiler_params=pltpu.CompilerParams(
            dimension_semantics=("parallel",)),
        cost_estimate=cost,
    )(x_num, x_idx_global, kp["sel"], kp["w1a"], kp["w1b"], kp["w2"],
      kp["wh"], kp["biases"])

    return out[:B, :dims["D_out"]]


def reference_forward(x_num, x_cat_idx, cat_sizes, raw):
    """Pure-JAX replica of FlatModel.forward for correctness checking."""
    B, F = x_num.shape
    E = raw["w_tok"].shape[1]
    emb = x_num[:, :, None] * raw["w_tok"][None] + raw["b_tok"][None]
    emb = jax.nn.relu(emb).reshape(B, F * E)
    onehot = jnp.concatenate(
        [jax.nn.one_hot(x_cat_idx[:, i], cs, dtype=jnp.float32)
         for i, cs in enumerate(cat_sizes)], axis=1)
    x = jnp.concatenate([emb, onehot], axis=1)
    h = jax.nn.relu(x @ raw["w1"] + raw["b1"])
    h = jax.nn.relu(h @ raw["w2"] + raw["b2"])
    return h @ raw["wh"] + raw["bh"]


if __name__ == "__main__":
    # Module-consistent shapes; batch 256 with tb=128 gives 2 grid steps
    # (both v7x TensorCores busy) while staying small.
    B, F, E = 256, 8, 8               # batch, n_num_features, d_num_embedding
    cat_sizes = [3, 5, 7]             # categorical cardinalities (one-hot path)
    C = sum(cat_sizes)
    H1, H2 = 32, 32                   # mlp d_layers
    D_out = 3                         # dataset.nn_output_dim

    key = jax.random.PRNGKey(0)
    ks = jax.random.split(key, 10)

    def unif(k, shape, fan_in):
        b = 1.0 / (float(fan_in) ** 0.5)
        return jax.random.uniform(k, shape, jnp.float32, -b, b)

    raw = {
        # NumericalFeatureTokenizer (uniform init, like rtdl)
        "w_tok": unif(ks[0], (F, E), E),
        "b_tok": unif(ks[1], (F, E), E),
        # MLP.make_baseline weights, stored as (d_in, d_out)
        "w1": unif(ks[2], (F * E + C, H1), F * E + C),
        "b1": unif(ks[3], (H1,), F * E + C),
        "w2": unif(ks[4], (H1, H2), H1),
        "b2": unif(ks[5], (H2,), H1),
        "wh": unif(ks[6], (H2, D_out), H2),
        "bh": unif(ks[7], (D_out,), H2),
    }

    # Inputs.
    x_num = jax.random.normal(ks[8], (B, F), jnp.float32)
    cat_keys = jax.random.split(ks[9], len(cat_sizes))
    x_cat_idx = jnp.stack(
        [jax.random.randint(k, (B,), 0, cs) for k, cs in zip(cat_keys, cat_sizes)],
        axis=1).astype(jnp.int32)

    ref = reference_forward(x_num, x_cat_idx, cat_sizes, raw)

    # f32 weights (exact path).
    kp32 = prepare_params(raw, F, E, cat_sizes, H1, H2, D_out, jnp.float32)
    out32 = jax.block_until_ready(flat_model_forward(x_num, x_cat_idx, kp32, tb=128))
    assert out32.shape == (B, D_out)
    assert jnp.allclose(out32, ref, atol=1e-3, rtol=1e-3), (
        float(jnp.max(jnp.abs(out32 - ref))))

    # bf16 weights (v6e/v7x path): halved weight HBM/VMEM traffic, f32 accumulation.
    kp16 = prepare_params(raw, F, E, cat_sizes, H1, H2, D_out, jnp.bfloat16)
    out16 = jax.block_until_ready(flat_model_forward(x_num, x_cat_idx, kp16, tb=128))
    assert out16.shape == (B, D_out)
    assert jnp.allclose(out16, ref, atol=5e-2, rtol=5e-2), (
        float(jnp.max(jnp.abs(out16 - ref))))

    print("KERNEL_OK")
</pallas_src>

<mosaic_0001>
module attributes {stable_mosaic.version = 11 : i64} {
  func.func @kernel(%arg0: i32, %arg1: memref<128x8xf32, #tpu.memory_space<vmem>>, %arg2: memref<128x3xi32, #tpu.memory_space<vmem>>, %arg3: memref<8x128xf32, #tpu.memory_space<vmem>>, %arg4: memref<128x128xf32, #tpu.memory_space<vmem>>, %arg5: memref<128x128xf32, #tpu.memory_space<vmem>>, %arg6: memref<128x128xf32, #tpu.memory_space<vmem>>, %arg7: memref<128x128xf32, #tpu.memory_space<vmem>>, %arg8: memref<4x128xf32, #tpu.memory_space<vmem>>, %arg9: memref<128x128xf32, #tpu.memory_space<vmem>>) attributes {dimension_semantics = [#tpu.dimension_semantics<parallel>], iteration_bounds = array<i64: 2>, scalar_prefetch = 0 : i64, scratch_operands = 0 : i64, tpu.core_type = #tpu.core_type<tc>, window_params = [{transform_indices = @transform_0, window_bounds = array<i64: 128, 8>}, {transform_indices = @transform_1, window_bounds = array<i64: 128, 3>}, {pipeline_mode = #tpu.pipeline_mode<synchronous>, transform_indices = @transform_2, window_bounds = array<i64: 8, 128>}, {pipeline_mode = #tpu.pipeline_mode<synchronous>, transform_indices = @transform_3, window_bounds = array<i64: 128, 128>}, {pipeline_mode = #tpu.pipeline_mode<synchronous>, transform_indices = @transform_4, window_bounds = array<i64: 128, 128>}, {pipeline_mode = #tpu.pipeline_mode<synchronous>, transform_indices = @transform_5, window_bounds = array<i64: 128, 128>}, {pipeline_mode = #tpu.pipeline_mode<synchronous>, transform_indices = @transform_6, window_bounds = array<i64: 128, 128>}, {pipeline_mode = #tpu.pipeline_mode<synchronous>, transform_indices = @transform_7, window_bounds = array<i64: 4, 128>}, {transform_indices = @transform_8, window_bounds = array<i64: 128, 128>}]} {
    %c0 = arith.constant 0 : index
    %c0_0 = arith.constant 0 : index
    %0 = vector.load %arg8[%c0, %c0_0] : memref<4x128xf32, #tpu.memory_space<vmem>>, vector<4x128xf32>
    %c0_1 = arith.constant 0 : index
    %c0_2 = arith.constant 0 : index
    %1 = vector.load %arg1[%c0_1, %c0_2] : memref<128x8xf32, #tpu.memory_space<vmem>>, vector<128x8xf32>
    %c0_3 = arith.constant 0 : index
    %c0_4 = arith.constant 0 : index
    %2 = vector.load %arg3[%c0_3, %c0_4] : memref<8x128xf32, #tpu.memory_space<vmem>>, vector<8x128xf32>
    %cst = arith.constant dense<0.000000e+00> : vector<128x128xf32>
    %3 = tpu.matmul %1, %2, %cst {dimension_numbers = #tpu.dot_dimension_numbers<[1], [0], [0], [1], [0, 0, 1, 1], [], []>} : vector<128x8xf32>, vector<8x128xf32>, vector<128x128xf32> -> vector<128x128xf32>
    %4 = vector.extract_strided_slice %0 {offsets = [0, 0], sizes = [1, 128], strides = [1, 1]} : vector<4x128xf32> to vector<1x128xf32>
    %5 = vector.broadcast %4 : vector<1x128xf32> to vector<128x128xf32>
    %6 = arith.addf %3, %5 : vector<128x128xf32>
    %cst_5 = arith.constant 0.000000e+00 : f32
    %7 = vector.broadcast %cst_5 : f32 to vector<128x128xf32>
    %8 = arith.maximumf %6, %7 : vector<128x128xf32>
    %c0_6 = arith.constant 0 : index
    %c0_7 = arith.constant 0 : index
    %9 = vector.load %arg2[%c0_6, %c0_7] : memref<128x3xi32, #tpu.memory_space<vmem>>, vector<128x3xi32>
    %10 = tpu.iota {dimensions = array<i32: 1>} : vector<128x128xi32>
    %cst_8 = arith.constant 0.000000e+00 : f32
    %11 = vector.broadcast %cst_8 : f32 to vector<128x128xf32>
    %12 = vector.extract_strided_slice %9 {offsets = [0, 0], sizes = [128, 1], strides = [1, 1]} : vector<128x3xi32> to vector<128x1xi32>
    %13 = vector.broadcast %12 : vector<128x1xi32> to vector<128x128xi32>
    %14 = arith.cmpi eq, %10, %13 : vector<128x128xi32>
    %15 = arith.extui %14 : vector<128x128xi1> to vector<128x128xi32>
    %16 = arith.sitofp %15 : vector<128x128xi32> to vector<128x128xf32>
    %17 = arith.addf %11, %16 : vector<128x128xf32>
    %18 = vector.extract_strided_slice %9 {offsets = [0, 1], sizes = [128, 1], strides = [1, 1]} : vector<128x3xi32> to vector<128x1xi32>
    %19 = vector.broadcast %18 : vector<128x1xi32> to vector<128x128xi32>
    %20 = arith.cmpi eq, %10, %19 : vector<128x128xi32>
    %21 = arith.extui %20 : vector<128x128xi1> to vector<128x128xi32>
    %22 = arith.sitofp %21 : vector<128x128xi32> to vector<128x128xf32>
    %23 = arith.addf %17, %22 : vector<128x128xf32>
    %24 = vector.extract_strided_slice %9 {offsets = [0, 2], sizes = [128, 1], strides = [1, 1]} : vector<128x3xi32> to vector<128x1xi32>
    %25 = vector.broadcast %24 : vector<128x1xi32> to vector<128x128xi32>
    %26 = arith.cmpi eq, %10, %25 : vector<128x128xi32>
    %27 = arith.extui %26 : vector<128x128xi1> to vector<128x128xi32>
    %28 = arith.sitofp %27 : vector<128x128xi32> to vector<128x128xf32>
    %29 = arith.addf %23, %28 : vector<128x128xf32>
    %c0_9 = arith.constant 0 : index
    %c0_10 = arith.constant 0 : index
    %30 = vector.load %arg4[%c0_9, %c0_10] : memref<128x128xf32, #tpu.memory_space<vmem>>, vector<128x128xf32>
    %cst_11 = arith.constant dense<0.000000e+00> : vector<128x128xf32>
    %31 = tpu.matmul %8, %30, %cst_11 {dimension_numbers = #tpu.dot_dimension_numbers<[1], [0], [0], [1], [0, 0, 1, 1], [], []>} : vector<128x128xf32>, vector<128x128xf32>, vector<128x128xf32> -> vector<128x128xf32>
    %c0_12 = arith.constant 0 : index
    %c0_13 = arith.constant 0 : index
    %32 = vector.load %arg5[%c0_12, %c0_13] : memref<128x128xf32, #tpu.memory_space<vmem>>, vector<128x128xf32>
    %cst_14 = arith.constant dense<0.000000e+00> : vector<128x128xf32>
    %33 = tpu.matmul %29, %32, %cst_14 {dimension_numbers = #tpu.dot_dimension_numbers<[1], [0], [0], [1], [0, 0, 1, 1], [], []>} : vector<128x128xf32>, vector<128x128xf32>, vector<128x128xf32> -> vector<128x128xf32>
    %34 = arith.addf %31, %33 : vector<128x128xf32>
    %35 = vector.extract_strided_slice %0 {offsets = [1, 0], sizes = [1, 128], strides = [1, 1]} : vector<4x128xf32> to vector<1x128xf32>
    %36 = vector.broadcast %35 : vector<1x128xf32> to vector<128x128xf32>
    %37 = arith.addf %34, %36 : vector<128x128xf32>
    %cst_15 = arith.constant 0.000000e+00 : f32
    %38 = vector.broadcast %cst_15 : f32 to vector<128x128xf32>
    %39 = arith.maximumf %37, %38 : vector<128x128xf32>
    %c0_16 = arith.constant 0 : index
    %c0_17 = arith.constant 0 : index
    %40 = vector.load %arg6[%c0_16, %c0_17] : memref<128x128xf32, #tpu.memory_space<vmem>>, vector<128x128xf32>
    %cst_18 = arith.constant dense<0.000000e+00> : vector<128x128xf32>
    %41 = tpu.matmul %39, %40, %cst_18 {dimension_numbers = #tpu.dot_dimension_numbers<[1], [0], [0], [1], [0, 0, 1, 1], [], []>} : vector<128x128xf32>, vector<128x128xf32>, vector<128x128xf32> -> vector<128x128xf32>
    %42 = vector.extract_strided_slice %0 {offsets = [2, 0], sizes = [1, 128], strides = [1, 1]} : vector<4x128xf32> to vector<1x128xf32>
    %43 = vector.broadcast %42 : vector<1x128xf32> to vector<128x128xf32>
    %44 = arith.addf %41, %43 : vector<128x128xf32>
    %cst_19 = arith.constant 0.000000e+00 : f32
    %45 = vector.broadcast %cst_19 : f32 to vector<128x128xf32>
    %46 = arith.maximumf %44, %45 : vector<128x128xf32>
    %c0_20 = arith.constant 0 : index
    %c0_21 = arith.constant 0 : index
    %47 = vector.load %arg7[%c0_20, %c0_21] : memref<128x128xf32, #tpu.memory_space<vmem>>, vector<128x128xf32>
    %cst_22 = arith.constant dense<0.000000e+00> : vector<128x128xf32>
    %48 = tpu.matmul %46, %47, %cst_22 {dimension_numbers = #tpu.dot_dimension_numbers<[1], [0], [0], [1], [0, 0, 1, 1], [], []>} : vector<128x128xf32>, vector<128x128xf32>, vector<128x128xf32> -> vector<128x128xf32>
    %49 = vector.extract_strided_slice %0 {offsets = [3, 0], sizes = [1, 128], strides = [1, 1]} : vector<4x128xf32> to vector<1x128xf32>
    %50 = vector.broadcast %49 : vector<1x128xf32> to vector<128x128xf32>
    %51 = arith.addf %48, %50 : vector<128x128xf32>
    %c0_23 = arith.constant 0 : index
    %c0_24 = arith.constant 0 : index
    %52 = vector.load %arg9[%c0_23, %c0_24] : memref<128x128xf32, #tpu.memory_space<vmem>>, vector<128x128xf32>
    tpu.vector_store %arg9[%c0_23, %c0_24], %51 {strides = array<i32>} : memref<128x128xf32, #tpu.memory_space<vmem>>, vector<128x128xf32>,
    return
  }
  func.func @transform_0(%arg0: i32) -> (i32, i32) {
    %c0_i32 = arith.constant 0 : i32
    %c0_i32_0 = arith.constant 0 : i32
    return %arg0, %c0_i32 : i32, i32
  }
  func.func @transform_1(%arg0: i32) -> (i32, i32) {
    %c0_i32 = arith.constant 0 : i32
    %c0_i32_0 = arith.constant 0 : i32
    return %arg0, %c0_i32 : i32, i32
  }
  func.func @transform_2(%arg0: i32) -> (i32, i32) {
    %c0_i32 = arith.constant 0 : i32
    %c0_i32_0 = arith.constant 0 : i32
    %c0_i32_1 = arith.constant 0 : i32
    return %c0_i32, %c0_i32_0 : i32, i32
  }
  func.func @transform_3(%arg0: i32) -> (i32, i32) {
    %c0_i32 = arith.constant 0 : i32
    %c0_i32_0 = arith.constant 0 : i32
    %c0_i32_1 = arith.constant 0 : i32
    return %c0_i32, %c0_i32_0 : i32, i32
  }
  func.func @transform_4(%arg0: i32) -> (i32, i32) {
    %c0_i32 = arith.constant 0 : i32
    %c0_i32_0 = arith.constant 0 : i32
    %c0_i32_1 = arith.constant 0 : i32
    return %c0_i32, %c0_i32_0 : i32, i32
  }
  func.func @transform_5(%arg0: i32) -> (i32, i32) {
    %c0_i32 = arith.constant 0 : i32
    %c0_i32_0 = arith.constant 0 : i32
    %c0_i32_1 = arith.constant 0 : i32
    return %c0_i32, %c0_i32_0 : i32, i32
  }
  func.func @transform_6(%arg0: i32) -> (i32, i32) {
    %c0_i32 = arith.constant 0 : i32
    %c0_i32_0 = arith.constant 0 : i32
    %c0_i32_1 = arith.constant 0 : i32
    return %c0_i32, %c0_i32_0 : i32, i32
  }
  func.func @transform_7(%arg0: i32) -> (i32, i32) {
    %c0_i32 = arith.constant 0 : i32
    %c0_i32_0 = arith.constant 0 : i32
    %c0_i32_1 = arith.constant 0 : i32
    return %c0_i32, %c0_i32_0 : i32, i32
  }
  func.func @transform_8(%arg0: i32) -> (i32, i32) {
    %c0_i32 = arith.constant 0 : i32
    %c0_i32_0 = arith.constant 0 : i32
    return %arg0, %c0_i32 : i32, i32
  }
}

</mosaic_0001>

<bundles_post_ra>
// kernel: tpu_custom_call.1
= control target key start
LH: loop header
LB: loop body
LE: loop exit
PB: predicated region body
PF: predicated region fallthrough
CT: control target
= control target key end

     0   :  { %13 = vsyncpa [#allocation3], 0  ;;  %s3191_s0 = inlined_call_operand.vmem [shape: f32[256,8], index: 0, kind: input, shape index: {}]   ;;  %s3192_s1 = inlined_call_operand.vmem [shape: s32[256,3], index: 1, kind: input, shape index: {}]   ;;  %s3193_s2 = inlined_call_operand.vmem [shape: f32[8,128], index: 2, kind: input, shape index: {}]   ;;  %s3194_s3 = inlined_call_operand.vmem [shape: f32[128,128], index: 3, kind: input, shape index: {}]   ;;  %s3195_s4 = inlined_call_operand.vmem [shape: f32[128,128], index: 4, kind: input, shape index: {}]   ;;  %s3196_s5 = inlined_call_operand.vmem [shape: f32[128,128], index: 5, kind: input, shape index: {}]   ;;  %s3197_s6 = inlined_call_operand.vmem [shape: f32[128,128], index: 6, kind: input, shape index: {}]   ;;  %s3198_s7 = inlined_call_operand.vmem [shape: f32[4,128], index: 7, kind: input, shape index: {}]   ;;  %s3199_s8 = inlined_call_operand.hbm [shape: f32[256,128], index: 8, kind: output, shape index: {}]  }
   0x1   :  { %15 = vsyncpa [#allocation3 + $0x1], 0  ;;  %s2530_s27 = smov 0   ;;  %s2532_s28 = smov 0  }
   0x2   :  { %s2534_s29 = smov 0   ;;  %s2536_s30 = smov 0  }
   0x3 LB: > { %s2551_s9 = sadd.s32 4294967295, %s2476_s30   ;;  %s1723_s10 = sadd.s32 4294967294, %s2476_s30   ;;  %s2476_s30 = sphi %s2536_s30, %s3205_s30   ;;  %s2472_s29 = sphi %s2534_s29, %s3204_s29   ;;  %s2468_s28 = sphi %s2532_s28, %s3203_s28   ;;  %s2464_s27 = sphi %s2530_s27, %s3202_s27  }
   0x4   : > { %s2555_s11 = sadd.s32 1, %s2476_s30   ;;  %s206_s12 = sadd.s32 1, %s2472_s29 }
   0x5   : > { %s203_s13 = ssub.s32 %s2476_s30, %s2555_s11  ;;  %p216_p0 = scmp.ne.s32.totalorder %s2472_s29, %s2468_s28 }
   0x6   : > { %p204_p1 = scmp.eq.s32.totalorder %s203_s13, 0  ;;  %p217_p2 = scmp.eq.s32.totalorder %s2551_s9, 1 }
   0x7   : > { %p222_p3 = scmp.ne.s32.totalorder %s2468_s28, %s2464_s27  ;;  %p223_p4 = scmp.eq.s32.totalorder %s1723_s10, 1 }
   0x8   : > { %s2566_s14 = scalar_select %p204_p1, %s2472_s29, %s206_s12  }
   0x9   : > { %p2568_p5 = por %p217_p2, %p216_p0  ;;  %p2572_p6 = por %p223_p4, %p222_p3 }
   0xa   : > { %p1726_p7 = scmp.ge.s32.totalorder %s2476_s30, 1  ;;  %p277_p8 = scmp.lt.s32.totalorder %s2476_s30, 3 }
   0xc   : > { %p278_p9 = pnand %p1726_p7, %p277_p8 }
   0xd   : > { %s1728_s17 = sshll.u32 (!%p278_p9), %s2551_s9, 4  ;;  %v346_v0 = vld [vmem:[%s3193_s2] sm:$0xff] (!%p278_p9)  ;;  %v2478_v1 = vmov (!%p278_p9), 0   ;;  %vm351_vm0 = vcmask (!%p278_p9), 64512   ;;  %v2479_v5 = vmov (!%p278_p9), 1   ;;  %v2480_v10 = vmov (!%p278_p9), 2  }
   0xe   : > { %281 = sbr.rel (%p278_p9) target bundleno = 999 (0x3e7), region = 52  ;;  %2388 = vset.pattern.permute.xlu1 (!%p278_p9), %v2478_v1  ;;  %2386 = vset.pattern.permute.xlu0 (!%p278_p9), %v2478_v1  ;;  %p317_p10 = scmp.lt.s32.totalorder (!%p278_p9), %s1728_s17, 31  ;;  %v931_v12 = vld [vmem:[%s3195_s4] sm:$0xff] (!%p278_p9)  ;;  %v932_v13 = vld [vmem:[%s3195_s4 + $0x8] sm:$0xff] (!%p278_p9)  ;;  %v933_v18 = vld [vmem:[%s3195_s4 + $0x10] sm:$0xff] (!%p278_p9)  ;;  %v347_v62 = vlaneseq (!%p278_p9) }
   0xf   : > { %1947 = vmatprep.subr.mxu0 (!%p278_p9), %v346_v0  ;;  %v2197_v16 = vpack.c.bf16 (!%p278_p9), %v932_v13, %v931_v12  ;;  %v934_v19 = vld [vmem:[%s3195_s4 + $0x18] sm:$0xff] (!%p278_p9)  ;;  %v935_v24 = vld [vmem:[%s3195_s4 + $0x20] sm:$0xff] (!%p278_p9)  ;;  %v936_v25 = vld [vmem:[%s3195_s4 + $0x28] sm:$0xff] (!%p278_p9)  ;;  %s313_s18 = sand.u32 (!%p278_p9), 1, %s2468_s28   ;;  %s2482_s12 = smov (!%p278_p9), [#allocation2]  }
  0x10   : > { %1948 = vmatpush3.msra.mxu0 (!%p278_p9), %v346_v0  ;;  %v2201_v21 = vpack.c.bf16 (!%p278_p9), %v934_v19, %v933_v18  ;;  %v2205_v27 = vpack.c.bf16 (!%p278_p9), %v936_v25, %v935_v24  ;;  %v937_v30 = vld [vmem:[%s3195_s4 + $0x30] sm:$0xff] (!%p278_p9)  ;;  %v938_v31 = vld [vmem:[%s3195_s4 + $0x38] sm:$0xff] (!%p278_p9)  ;;  %v939_v36 = vld [vmem:[%s3195_s4 + $0x40] sm:$0xff] (!%p278_p9)  ;;  %s1727_s19 = sshll.u32 (!%p278_p9), %s313_s18, 7 }
  0x11   : > { %2198 = vmatprep.subr.bf16.mxu1 (!%p278_p9), %v2197_v16  ;;  %v2209_v33 = vpack.c.bf16 (!%p278_p9), %v938_v31, %v937_v30  ;;  %v940_v37 = vld [vmem:[%s3195_s4 + $0x48] sm:$0xff] (!%p278_p9)  ;;  %v941_v42 = vld [vmem:[%s3195_s4 + $0x50] sm:$0xff] (!%p278_p9)  ;;  %v942_v43 = vld [vmem:[%s3195_s4 + $0x58] sm:$0xff] (!%p278_p9) }
  0x12   : > { %2200 = vmatpush3.bf16.msra.mxu1 (!%p278_p9), %v2197_v16  ;;  %v2213_v39 = vpack.c.bf16 (!%p278_p9), %v940_v37, %v939_v36  ;;  %v2217_v47 = vpack.c.bf16 (!%p278_p9), %v942_v43, %v941_v42  ;;  %v943_v49 = vld [vmem:[%s3195_s4 + $0x60] sm:$0xff] (!%p278_p9)  ;;  %v944_v50 = vld [vmem:[%s3195_s4 + $0x68] sm:$0xff] (!%p278_p9)  ;;  %v945_v52 = vld [vmem:[%s3195_s4 + $0x70] sm:$0xff] (!%p278_p9) }
  0x13   : > { %2202 = vmatprep.subr.bf16.mxu1 (!%p278_p9), %v2201_v21  ;;  %v2221_v51 = vpack.c.bf16 (!%p278_p9), %v944_v50, %v943_v49  ;;  %v946_v53 = vld [vmem:[%s3195_s4 + $0x78] sm:$0xff] (!%p278_p9)  ;;  %v915_v59 = vld [vmem:[%s3194_s3] sm:$0xff] (!%p278_p9)  ;;  %v916_v60 = vld [vmem:[%s3194_s3 + $0x8] sm:$0xff] (!%p278_p9) }
  0x14   : > { %v2225_v54 = vpack.c.bf16 (!%p278_p9), %v946_v53, %v945_v52  ;;  %v2755_v61 = vpack.c.bf16 (!%p278_p9), %v916_v60, %v915_v59  ;;  %v918_v30 = vld [vmem:[%s3194_s3 + $0x18] sm:$0xff] (!%p278_p9)  ;;  %v919_v43 = vld [vmem:[%s3194_s3 + $0x20] sm:$0xff] (!%p278_p9)  ;;  %v921_v53 = vld [vmem:[%s3194_s3 + $0x30] sm:$0xff] (!%p278_p9) }
  0x15   : > { %s3207_s17 = smov (!%p317_p10, %s1728_s17), 31 }
  0x16   : > { %s1729_s20 = sshll.u32 %s3207_s17, 3  ;;  %2204 = vmatpush3.bf16.msra.mxu1 %v2201_v21 }
  0x17   : > { %s2587_s23 = scalar_lea.vmem %s3192_s1, %s1729_s20  ;;  %s2597_s26 = scalar_lea.vmem %s3191_s0, %s1729_s20  ;;  %2206 = vmatprep.subr.bf16.mxu1 %v2205_v27 }
  0x18   : > { %v2590_v2 = vld [vmem:[%s2587_s23 + $0x8] sm:$0xff]  ;;  %v561_v3 = vld [vmem:[%s2587_s23] sm:$0xff]  ;;  %v332_v7 = vld [vmem:[%s2597_s26 + $0x10] sm:$0xff]  ;;  %s3121_s20 = scalar_lea.vmem [#allocation2], %s1727_s19 }
  0x19   : > { %583 = vperm.xlu1 %2388, %v2590_v2   ;;  %580 = vperm.xlu0 %2386, %v561_v3   ;;  %v330_v4 = vld [vmem:[%s2597_s26] sm:$0xff]  ;;  %v331_v6 = vld [vmem:[%s2597_s26 + $0x8] sm:$0xff]  ;;  %v2607_v8 = vld [vmem:[%s2587_s23 + $0x18] sm:$0xff]  ;;  %s1649_s21 = sshll.u32 %s3121_s20, 4  ;;  %s3144_s21 = int_to_ptr.vmem [resolvable:$true] %s1649_s21 }
  0x1a   : > { %1949 = vmatprep.mubr.msk.f32.mxu0 %vm351_vm0, %v330_v4  ;;  %v333_v9 = vld [vmem:[%s2597_s26 + $0x18] sm:$0xff]  ;;  %v334_v11 = vld [vmem:[%s2597_s26 + $0x20] sm:$0xff]  ;;  %v2623_v14 = vld [vmem:[%s2587_s23 + $0x28] sm:$0xff]  ;;  %2208 = vmatpush3.bf16.msra.mxu1 %v2205_v27  ;;  %s2414_s10 = scalar_lea.vmem %s3144_s21, 2048 }
  0x1b   : > { %1950 = vmatmul.mubr.msk.f32.vlgmr.msra.gmra.mrb[0].mxu0 %vm351_vm0, %v331_v6  ;;  %v563_v15 = vld [vmem:[%s2587_s23 + $0x10] sm:$0xff]  ;;  %v335_v17 = vld [vmem:[%s2597_s26 + $0x28] sm:$0xff]  ;;  %v2639_v22 = vld [vmem:[%s2587_s23 + $0x38] sm:$0xff]  ;;  %2210 = vmatprep.subr.bf16.mxu1 %v2209_v33  ;;  %p2415_p11 = scmp.ne.s32.totalorder %s3144_s21, %s2414_s10 }
  0x1c   : > { %1952 = vmatprep.mubr.msk.f32.mxu0 %vm351_vm0, %v332_v7  ;;  %v336_v20 = vld [vmem:[%s2597_s26 + $0x30] sm:$0xff]  ;;  %v337_v23 = vld [vmem:[%s2597_s26 + $0x38] sm:$0xff]  ;;  %v338_v26 = vld [vmem:[%s2597_s26 + $0x40] sm:$0xff]  ;;  %v2481_v7 = vmov 0.0  }
  0x1d   : > { %2389 = vset.pattern.permute.xlu1 %v2479_v5  ;;  %2387 = vset.pattern.permute.xlu0 %v2479_v5  ;;  %v2654_v28 = vld [vmem:[%s2587_s23 + $0x48] sm:$0xff]  ;;  %v340_v32 = vld [vmem:[%s2597_s26 + $0x50] sm:$0xff]  ;;  %v2668_v34 = vld [vmem:[%s2587_s23 + $0x58] sm:$0xff]  ;;  %p2416_p12 = pnand %p2415_p11, %p2568_p5 }
  0x1e   : > { %695 = vperm.xlu1 %2389, %v2590_v2   ;;  %692 = vperm.xlu0 %2387, %v561_v3   ;;  %v339_v29 = vld [vmem:[%s2597_s26 + $0x48] sm:$0xff]  ;;  %v341_v35 = vld [vmem:[%s2597_s26 + $0x58] sm:$0xff]  ;;  %v342_v38 = vld [vmem:[%s2597_s26 + $0x60] sm:$0xff] }
  0x1f   : > { %1953 = vmatmul.mubr.msk.f32.gmra.mrb[2].mxu0 %vm351_vm0, %v333_v9  ;;  %v2683_v40 = vld [vmem:[%s2587_s23 + $0x68] sm:$0xff]  ;;  %v344_v44 = vld [vmem:[%s2597_s26 + $0x70] sm:$0xff]  ;;  %2212 = vmatpush3.bf16.msra.mxu1 %v2209_v33  ;;  %v565_v45 = vld [vmem:[%s2587_s23 + $0x20] sm:$0xff]  ;;  %p2417_p13 = pneg %p2416_p12 }
  0x20   : > { %1955 = vmatprep.mubr.msk.f32.mxu0 %vm351_vm0, %v334_v11  ;;  %v343_v41 = vld [vmem:[%s2597_s26 + $0x68] sm:$0xff]  ;;  %2214 = vmatprep.subr.bf16.mxu1 %v2213_v39  ;;  %v2699_v46 = vld [vmem:[%s2587_s23 + $0x78] sm:$0xff]  ;;  %v567_v55 = vld [vmem:[%s2587_s23 + $0x30] sm:$0xff] }
  0x21   : > { %v345_v48 = vld [vmem:[%s2597_s26 + $0x78] sm:$0xff]  ;;  %v569_v56 = vld [vmem:[%s2587_s23 + $0x40] sm:$0xff]  ;;  %v571_v57 = vld [vmem:[%s2587_s23 + $0x50] sm:$0xff]  ;;  %s1801_s26 = sshll.u32 %s2551_s9, 11  ;;  %s3150_s9 = scalar_lea.sflag [#allocation3], %s313_s18 }
  0x22   : > { %2390 = vset.pattern.permute.xlu1 %v2480_v10  ;;  %2393 = vset.pattern.permute.xlu0 %v2478_v1  ;;  %v573_v58 = vld [vmem:[%s2587_s23 + $0x60] sm:$0xff]  ;;  %v575_v63 = vld [vmem:[%s2587_s23 + $0x70] sm:$0xff]  ;;  %s3142_s25 = scalar_lea.hbm %s3199_s8, %s1801_s26  ;;  %s2418_s23 = sshll.u32 %s2482_s12, 4  ;;  %s2419_s23 = int_to_ptr.vmem [resolvable:$false] %s2418_s23 }
  0x23   : > { %804 = vperm.xlu1 %2390, %v561_v3   ;;  %589 = vperm.xlu0 %2393, %v2607_v8   ;;  %v2762_v3 = vand.u32 127, %v347_v62  ;;  %s2420_s13 = scalar_lea.vmem %s2419_s23, 4096  ;;  %p2421_p0 = scmp.lt.s32.totalorder %s3144_s21, %s2419_s23 }
  0x24   : > { %1956 = vmatmul.mubr.msk.f32.gmra.mrb[4].mxu0 %vm351_vm0, %v335_v17  ;;  %2216 = vmatpush3.bf16.msra.mxu1 %v2213_v39  ;;  %p2422_p1 = scmp.lt.s32.totalorder %s2420_s13, %s2414_s10 }
  0x25   : > { %1958 = vmatprep.mubr.msk.f32.mxu0 %vm351_vm0, %v336_v20  ;;  %2218 = vmatprep.subr.bf16.mxu1 %v2217_v47 }
  0x26   : > { %p2423_p2 = por %p2422_p1, %p2421_p0 }
  0x27   : > { %2391 = vset.pattern.permute.xlu1 %v2478_v1  ;;  %595 = vperm.xlu0 %2393, %v2623_v14  }
  0x28   : > { %586 = vperm.xlu1 %2391, %v563_v15   ;;  %1959 = vmatmul.mubr.msk.f32.gmra.mrb[6].mxu0 %vm351_vm0, %v337_v23  ;;  %p2424_p3 = pnand %p2423_p2, %p2417_p13 }
  0x29   : > { %1961 = vmatprep.mubr.msk.f32.mxu0 %vm351_vm0, %v338_v26  ;;  %2220 = vmatpush3.bf16.msra.mxu1 %v2217_v47 }
  0x2a   : > { %2222 = vmatprep.subr.bf16.mxu1 %v2221_v51 }
  0x2b   : > { %601 = vperm.xlu0 %2393, %v2639_v22  }
  0x2c   : > { %2392 = vset.pattern.permute.xlu1 %v2479_v5  ;;  %1962 = vmatmul.mubr.msk.f32.gmra.mrb[8].mxu0 %vm351_vm0, %v339_v29  ;;  %v917_v29 = vld [vmem:[%s3194_s3 + $0x10] sm:$0xff] }
  0x2d   : > { %698 = vperm.xlu1 %2392, %v563_v15   ;;  %1964 = vmatprep.mubr.msk.f32.mxu0 %vm351_vm0, %v340_v32  ;;  %v2233_v39 = vpack.c.bf16 %v918_v30, %v917_v29 }
  0x2e   : > { %2224 = vmatpush3.bf16.msra.mxu1 %v2221_v51 }
  0x2f   : > { %607 = vperm.xlu0 %2393, %v2654_v28   ;;  %2226 = vmatprep.subr.bf16.mxu1 %v2225_v54 }
  0x30   : > { %1965 = vmatmul.mubr.msk.f32.gmra.mrb[10].mxu0 %vm351_vm0, %v341_v35 }
  0x31   : > { %701 = vperm.xlu1 %2392, %v2607_v8   ;;  %1967 = vmatprep.mubr.msk.f32.mxu0 %vm351_vm0, %v342_v38 }
  0x32   : > { %2228 = vmatpush3.bf16.msra.mxu1 %v2225_v54  ;;  %v922_v54 = vld [vmem:[%s3194_s3 + $0x38] sm:$0xff] }
  0x33   : > { %613 = vperm.xlu0 %2393, %v2668_v34   ;;  %2230 = vmatprep.subr.bf16.mxu1 %v2755_v61 }
  0x34   : > { %1968 = vmatmul.mubr.msk.f32.gmra.mrb[12].mxu0 %vm351_vm0, %v343_v41 }
  0x35   : > { %2394 = vset.pattern.permute.xlu1 %v2480_v10  ;;  %1970 = vmatprep.mubr.msk.f32.mxu0 %vm351_vm0, %v344_v44  ;;  %v920_v44 = vld [vmem:[%s3194_s3 + $0x28] sm:$0xff] }
  0x36   : > { %810 = vperm.xlu1 %2394, %v563_v15   ;;  %v2237_v49 = vpack.c.bf16 %v920_v44, %v919_v43  ;;  %v1283_v44 = vld [vmem:[%s3196_s5 + $0x50] sm:$0xff] }
  0x37   : > { %619 = vperm.xlu0 %2393, %v2683_v40  }
  0x38   : > { %1971 = vmatmul.mubr.msk.f32.gmra.mrb[14].mxu0 %vm351_vm0, %v345_v48 }
  0x3a   : > { %2395 = vset.pattern.permute.xlu1 %v2478_v1 }
  0x3b   : > { %592 = vperm.xlu1 %2395, %v565_v45   ;;  %625 = vperm.xlu0 %2393, %v2699_v46  }
  0x3f   : > { %2396 = vset.pattern.permute.xlu1 %v2479_v5  ;;  %2412 = vset.pattern.permute.xlu0 %v2480_v10 }
  0x40   : > { %704 = vperm.xlu1 %2396, %v565_v45   ;;  %807 = vperm.xlu0 %2412, %v2590_v2  }
  0x44   : > { %707 = vperm.xlu1 %2396, %v2623_v14   ;;  %813 = vperm.xlu0 %2412, %v2607_v8  }
  0x48   : > { %2397 = vset.pattern.permute.xlu1 %v2480_v10  ;;  %819 = vperm.xlu0 %2412, %v2623_v14  }
  0x49   : > { %816 = vperm.xlu1 %2397, %v565_v45  }
  0x4c   : > { %825 = vperm.xlu0 %2412, %v2639_v22  }
  0x4d   : > { %2398 = vset.pattern.permute.xlu1 %v2478_v1 }
  0x4e   : > { %598 = vperm.xlu1 %2398, %v567_v55  }
  0x50   : > { %831 = vperm.xlu0 %2412, %v2654_v28  }
  0x52   : > { %2399 = vset.pattern.permute.xlu1 %v2479_v5 }
  0x53   : > { %710 = vperm.xlu1 %2399, %v567_v55  }
  0x54   : > { %837 = vperm.xlu0 %2412, %v2668_v34  }
  0x57   : > { %713 = vperm.xlu1 %2399, %v2639_v22  }
  0x58   : > { %843 = vperm.xlu0 %2412, %v2683_v40  }
  0x5b   : > { %2400 = vset.pattern.permute.xlu1 %v2480_v10 }
  0x5c   : > { %822 = vperm.xlu1 %2400, %v567_v55   ;;  %849 = vperm.xlu0 %2412, %v2699_v46  }
  0x60   : > { %2401 = vset.pattern.permute.xlu1 %v2478_v1 }
  0x61   : > { %604 = vperm.xlu1 %2401, %v569_v56  }
  0x65   : > { %2402 = vset.pattern.permute.xlu1 %v2479_v5 }
  0x66   : > { %716 = vperm.xlu1 %2402, %v569_v56  }
  0x6a   : > { %719 = vperm.xlu1 %2402, %v2654_v28  }
  0x6e   : > { %2403 = vset.pattern.permute.xlu1 %v2480_v10 }
  0x6f   : > { %828 = vperm.xlu1 %2403, %v569_v56  }
  0x73   : > { %2404 = vset.pattern.permute.xlu1 %v2478_v1 }
  0x74   : > { %610 = vperm.xlu1 %2404, %v571_v57  }
  0x78   : > { %2405 = vset.pattern.permute.xlu1 %v2479_v5 }
  0x79   : > { %722 = vperm.xlu1 %2405, %v571_v57  }
  0x7d   : > { %725 = vperm.xlu1 %2405, %v2668_v34  }
  0x81   : > { %2406 = vset.pattern.permute.xlu1 %v2480_v10 }
  0x82   : > { %834 = vperm.xlu1 %2406, %v571_v57  }
  0x86   : > { %2407 = vset.pattern.permute.xlu1 %v2478_v1 }
  0x87   : > { %616 = vperm.xlu1 %2407, %v573_v58  }
  0x8b   : > { %2408 = vset.pattern.permute.xlu1 %v2479_v5 }
  0x8c   : > { %728 = vperm.xlu1 %2408, %v573_v58  }
  0x90   : > { %731 = vperm.xlu1 %2408, %v2683_v40  }
  0x94   : > { %2409 = vset.pattern.permute.xlu1 %v2480_v10 }
  0x95   : > { %840 = vperm.xlu1 %2409, %v573_v58  }
  0x98   : > { %v584_v0 = vpop.permute.xlu1 %583  ;;  %v581_v2 = vpop.permute.xlu0 %580 }
  0x99   : > { %2410 = vset.pattern.permute.xlu1 %v2478_v1  ;;  %vm627_vm1 = vcmp.eq.s32.totalorder %v2762_v3, %v581_v2  ;;  %vm628_vm6 = vcmp.eq.s32.totalorder %v2762_v3, %v584_v0  ;;  %v923_v0 = vld [vmem:[%s3194_s3 + $0x40] sm:$0xff]  ;;  %v924_v2 = vld [vmem:[%s3194_s3 + $0x48] sm:$0xff] }
  0x9a   : > { %622 = vperm.xlu1 %2410, %v575_v63   ;;  %v1748_v8 = vsel %vm627_vm1, 1.0, %v2481_v7  ;;  %v1749_v26 = vsel %vm628_vm6, 1.0, %v2481_v7 }
  0x9d   : > { %v696_v4 = vpop.permute.xlu1 %695  ;;  %v693_v6 = vpop.permute.xlu0 %692 }
  0x9e   : > { %2411 = vset.pattern.permute.xlu1 %v2479_v5  ;;  %vm739_vm2 = vcmp.eq.s32.totalorder %v2762_v3, %v693_v6  ;;  %vm740_vm4 = vcmp.eq.s32.totalorder %v2762_v3, %v696_v4 }
  0x9f   : > { %734 = vperm.xlu1 %2411, %v575_v63   ;;  %v1764_v9 = vsel %vm739_vm2, 1.0, %v2481_v7 }
  0xa0   : > { %v787_v11 = vadd.f32 %v1764_v9, %v1748_v8  ;;  %v1273_v8 = vld [vmem:[%s3196_s5] sm:$0xff]  ;;  %v1274_v9 = vld [vmem:[%s3196_s5 + $0x8] sm:$0xff] }
  0xa2   : > { %v805_v12 = vpop.permute.xlu1 %804  ;;  %v590_v13 = vpop.permute.xlu0 %589 }
  0xa3   : > { %vm851_vm3 = vcmp.eq.s32.totalorder %v2762_v3, %v805_v12  ;;  %737 = vperm.xlu1 %2411, %v2699_v46   ;;  %vm630_vm9 = vcmp.eq.s32.totalorder %v2762_v3, %v590_v13  ;;  %v2245_v12 = vpack.c.bf16 %v924_v2, %v923_v0  ;;  %v925_v13 = vld [vmem:[%s3194_s3 + $0x50] sm:$0xff] }
  0xa4   : > { %v1780_v1 = vsel %vm851_vm3, 1.0, %v2481_v7  ;;  %v1751_v34 = vsel %vm630_vm9, 1.0, %v2481_v7 }
  0xa5   : > { %v899_v14 = vadd.f32 %v1780_v1, %v787_v11  ;;  %v1275_v11 = vld [vmem:[%s3196_s5 + $0x10] sm:$0xff]  ;;  %v2261_v1 = vpack.c.bf16 %v1274_v9, %v1273_v8 }
  0xa6   : > { %v596_v15 = vpop.permute.xlu0 %595 }
  0xa7   : > { %2413 = vset.pattern.permute.xlu1 %v2480_v10  ;;  %v587_v16 = vpop.permute.xlu1 %586  ;;  %2005 = vmatprep.mubr.f32.mxu1 %v899_v14  ;;  %v1765_v10 = vsel %vm740_vm4, 1.0, %v2481_v7  ;;  %vm632_vm13 = vcmp.eq.s32.totalorder %v2762_v3, %v596_v15  ;;  %v1276_v14 = vld [vmem:[%s3196_s5 + $0x18] sm:$0xff] }
  0xa8   : > { %846 = vperm.xlu1 %2413, %v575_v63   ;;  %vm629_vm7 = vcmp.eq.s32.totalorder %v2762_v3, %v587_v16  ;;  %v788_v31 = vadd.f32 %v1765_v10, %v1749_v26  ;;  %v1753_v50 = vsel %vm632_vm13, 1.0, %v2481_v7  ;;  %v926_v15 = vld [vmem:[%s3194_s3 + $0x58] sm:$0xff]  ;;  %v2265_v16 = vpack.c.bf16 %v1276_v14, %v1275_v11  ;;  %2262 = vmatprep.subr.bf16.mxu0 %v2261_v1  ;;  %v927_v10 = vld [vmem:[%s3194_s3 + $0x60] sm:$0xff]  ;;  %v928_v26 = vld [vmem:[%s3194_s3 + $0x68] sm:$0xff] }
  0xa9   : > { %v1750_v32 = vsel %vm629_vm7, 1.0, %v2481_v7  ;;  %2264 = vmatpush3.bf16.msra.mxu0 %v2261_v1 }
  0xaa   : > { %v2774_v5 = vpop.permute.xlu0 %601  ;;  %2266 = vmatprep.subr.bf16.mxu0 %v2265_v16 }
  0xab   : > { %vm634_vm3 = vcmp.eq.s32.totalorder %v2762_v3, %v2774_v5  ;;  %v930_v5 = vld [vmem:[%s3194_s3 + $0x78] sm:$0xff] }
  0xac   : > { %v699_v17 = vpop.permute.xlu1 %698 }
  0xad   : > { %vm741_vm5 = vcmp.eq.s32.totalorder %v2762_v3, %v699_v17  ;;  %v1277_v17 = vld [vmem:[%s3196_s5 + $0x20] sm:$0xff]  ;;  %2268 = vmatpush3.bf16.msra.mxu0 %v2265_v16 }
  0xae   : > { %v2776_v18 = vpop.permute.xlu0 %607  ;;  %v1766_v25 = vsel %vm741_vm5, 1.0, %v2481_v7 }
  0xaf   : > { %v789_v35 = vadd.f32 %v1766_v25, %v1750_v32  ;;  %v929_v32 = vld [vmem:[%s3194_s3 + $0x70] sm:$0xff]  ;;  %vm636_vm9 = vcmp.eq.s32.totalorder %v2762_v3, %v2776_v18 }
  0xb0   : > { %v702_v19 = vpop.permute.xlu1 %701 }
  0xb1   : > { %vm742_vm10 = vcmp.eq.s32.totalorder %v2762_v3, %v702_v19  ;;  %v1278_v19 = vld [vmem:[%s3196_s5 + $0x28] sm:$0xff] }
  0xb2   : > { %v2778_v20 = vpop.permute.xlu0 %613  ;;  %v1767_v36 = vsel %vm742_vm10, 1.0, %v2481_v7  ;;  %v2269_v25 = vpack.c.bf16 %v1278_v19, %v1277_v17 }
  0xb3   : > { %v790_v45 = vadd.f32 %v1767_v36, %v1751_v34  ;;  %v1281_v34 = vld [vmem:[%s3196_s5 + $0x40] sm:$0xff]  ;;  %v1755_v36 = vsel %vm634_vm3, 1.0, %v2481_v7 }
  0xb4   : > { %2270 = vmatprep.subr.bf16.mxu0 %v2269_v25 }
  0xb5   : > { %v811_v21 = vpop.permute.xlu1 %810  ;;  %2272 = vmatpush3.bf16.msra.mxu0 %v2269_v25 }
  0xb6   : > { %v2780_v22 = vpop.permute.xlu0 %619  ;;  %vm853_vm8 = vcmp.eq.s32.totalorder %v2762_v3, %v811_v21 }
  0xb7   : > { %v1782_v33 = vsel %vm853_vm8, 1.0, %v2481_v7 }
  0xb8   : > { %v901_v40 = vadd.f32 %v1782_v33, %v789_v35  ;;  %v1282_v35 = vld [vmem:[%s3196_s5 + $0x48] sm:$0xff] }
  0xba   : > { %v593_v23 = vpop.permute.xlu1 %592  ;;  %v2783_v24 = vpop.permute.xlu0 %625 }
  0xbb   : > { %vm631_vm0 = vcmp.eq.s32.totalorder %v2762_v3, %v593_v23  ;;  %v2249_v23 = vpack.c.bf16 %v926_v15, %v925_v13 }
  0xbc   : > { %v1752_v55 = vsel %vm631_vm0, 1.0, %v2481_v7  ;;  %vm638_vm0 = vcmp.eq.s32.totalorder %v2762_v3, %v2778_v20 }
  0xbf   : > { %v705_v27 = vpop.permute.xlu1 %704  ;;  %v808_v28 = vpop.permute.xlu0 %807 }
  0xc0   : > { %vm852_vm11 = vcmp.eq.s32.totalorder %v2762_v3, %v808_v28  ;;  %vm743_vm12 = vcmp.eq.s32.totalorder %v2762_v3, %v705_v27  ;;  %v1279_v27 = vld [vmem:[%s3196_s5 + $0x30] sm:$0xff]  ;;  %v1280_v28 = vld [vmem:[%s3196_s5 + $0x38] sm:$0xff] }
  0xc1   : > { %v1781_v37 = vsel %vm852_vm11, 1.0, %v2481_v7  ;;  %v1768_v47 = vsel %vm743_vm12, 1.0, %v2481_v7  ;;  %v2273_v33 = vpack.c.bf16 %v1280_v28, %v1279_v27 }
  0xc2   : > { %v900_v38 = vadd.f32 %v1781_v37, %v788_v31  ;;  %v791_v57 = vadd.f32 %v1768_v47, %v1752_v55  ;;  %v2253_v31 = vpack.c.bf16 %v928_v26, %v927_v10  ;;  %v1759_v26 = vsel %vm638_vm0, 1.0, %v2481_v7 }
  0xc3   : > { %v708_v41 = vpop.permute.xlu1 %707  ;;  %v814_v42 = vpop.permute.xlu0 %813  ;;  %2274 = vmatprep.subr.bf16.mxu0 %v2273_v33 }
  0xc4   : > { %vm744_vm14 = vcmp.eq.s32.totalorder %v2762_v3, %v708_v41  ;;  %vm854_vm15 = vcmp.eq.s32.totalorder %v2762_v3, %v814_v42  ;;  %2006 = vmatmul.mubr.f32.vlgmr.msra.gmra.mrb[0].mxu1 %v900_v38  ;;  %2276 = vmatpush3.bf16.msra.mxu0 %v2273_v33 }
  0xc5   : > { %v1783_v46 = vsel %vm854_vm15, 1.0, %v2481_v7  ;;  %2008 = vmatprep.mubr.f32.mxu1 %v901_v40  ;;  %2232 = vmatpush3.bf16.msra.mxu1 %v2755_v61  ;;  %v1769_v51 = vsel %vm744_vm14, 1.0, %v2481_v7  ;;  %v2241_v61 = vpack.c.bf16 %v922_v54, %v921_v53  ;;  %v2277_v40 = vpack.c.bf16 %v1282_v35, %v1281_v34  ;;  %v1286_v53 = vld [vmem:[%s3196_s5 + $0x68] sm:$0xff] }
  0xc6   : > { %v902_v48 = vadd.f32 %v1783_v46, %v790_v45  ;;  %2234 = vmatprep.subr.bf16.mxu1 %v2233_v39  ;;  %v792_v59 = vadd.f32 %v1769_v51, %v1753_v50  ;;  %v1284_v45 = vld [vmem:[%s3196_s5 + $0x58] sm:$0xff] }
  0xc7   : > { %v820_v52 = vpop.permute.xlu0 %819  ;;  %2278 = vmatprep.subr.bf16.mxu0 %v2277_v40  ;;  %v2281_v50 = vpack.c.bf16 %v1284_v45, %v1283_v44 }
  0xc8   : > { %vm856_vm1 = vcmp.eq.s32.totalorder %v2762_v3, %v820_v52  ;;  %v817_v56 = vpop.permute.xlu1 %816  ;;  %2009 = vmatmul.mubr.f32.gmra.mrb[2].mxu1 %v902_v48  ;;  %v1285_v52 = vld [vmem:[%s3196_s5 + $0x60] sm:$0xff]  ;;  %2280 = vmatpush3.bf16.msra.mxu0 %v2277_v40 }
  0xc9   : > { %v1785_v58 = vsel %vm856_vm1, 1.0, %v2481_v7  ;;  %vm855_vm2 = vcmp.eq.s32.totalorder %v2762_v3, %v817_v56  ;;  %2236 = vmatpush3.bf16.msra.mxu1 %v2233_v39  ;;  %v2257_v39 = vpack.c.bf16 %v930_v5, %v929_v32  ;;  %2282 = vmatprep.subr.bf16.mxu0 %v2281_v50  ;;  %v2285_v55 = vpack.c.bf16 %v1286_v53, %v1285_v52 }
  0xca   : > { %v1784_v60 = vsel %vm855_vm2, 1.0, %v2481_v7  ;;  %2238 = vmatprep.subr.bf16.mxu1 %v2237_v49  ;;  %v904_v4 = vadd.f32 %v1785_v58, %v792_v59  ;;  %v1757_v59 = vsel %vm636_vm9, 1.0, %v2481_v7 }
  0xcb   : > { %v903_v63 = vadd.f32 %v1784_v60, %v791_v57  ;;  %v826_v30 = vpop.permute.xlu0 %825 }
  0xcc   : > { %vm858_vm7 = vcmp.eq.s32.totalorder %v2762_v3, %v826_v30  ;;  %2284 = vmatpush3.bf16.msra.mxu0 %v2281_v50 }
  0xcd   : > { %v599_v6 = vpop.permute.xlu1 %598  ;;  %2011 = vmatprep.mubr.f32.mxu1 %v903_v63  ;;  %2240 = vmatpush3.bf16.msra.mxu1 %v2237_v49  ;;  %v1787_v47 = vsel %vm858_vm7, 1.0, %v2481_v7 }
  0xce   : > { %2012 = vmatmul.mubr.f32.gmra.mrb[4].mxu1 %v904_v4  ;;  %2242 = vmatprep.subr.bf16.mxu1 %v2241_v61  ;;  %vm633_vm6 = vcmp.eq.s32.totalorder %v2762_v3, %v599_v6 }
  0xcf   : > { %v1754_v41 = vsel %vm633_vm6, 1.0, %v2481_v7  ;;  %2286 = vmatprep.subr.bf16.mxu0 %v2285_v55  ;;  %v832_v58 = vpop.permute.xlu0 %831  ;;  %vm640_vm6 = vcmp.eq.s32.totalorder %v2762_v3, %v2780_v22 }
  0xd0   : > { %2288 = vmatpush3.bf16.msra.mxu0 %v2285_v55  ;;  %vm860_vm13 = vcmp.eq.s32.totalorder %v2762_v3, %v832_v58 }
  0xd1   : > { %2244 = vmatpush3.bf16.msra.mxu1 %v2241_v61  ;;  %v1789_v4 = vsel %vm860_vm13, 1.0, %v2481_v7 }
  0xd2   : > { %v711_v21 = vpop.permute.xlu1 %710  ;;  %2246 = vmatprep.subr.bf16.mxu1 %v2245_v12 }
  0xd3   : > { %vm745_vm4 = vcmp.eq.s32.totalorder %v2762_v3, %v711_v21  ;;  %v838_v16 = vpop.permute.xlu0 %837 }
  0xd4   : > { %v1770_v38 = vsel %vm745_vm4, 1.0, %v2481_v7  ;;  %vm862_vm3 = vcmp.eq.s32.totalorder %v2762_v3, %v838_v16 }
  0xd5   : > { %2248 = vmatpush3.bf16.msra.mxu1 %v2245_v12  ;;  %v793_v46 = vadd.f32 %v1770_v38, %v1754_v41 }
  0xd6   : > { %v714_v29 = vpop.permute.xlu1 %713  ;;  %2250 = vmatprep.subr.bf16.mxu1 %v2249_v23 }
  0xd7   : > { %vm746_vm5 = vcmp.eq.s32.totalorder %v2762_v3, %v714_v29 }
  0xd8   : > { %v1771_v37 = vsel %vm746_vm5, 1.0, %v2481_v7 }
  0xd9   : > { %2252 = vmatpush3.bf16.msra.mxu1 %v2249_v23  ;;  %v794_v42 = vadd.f32 %v1771_v37, %v1755_v36 }
  0xda   : > { %2254 = vmatprep.subr.bf16.mxu1 %v2253_v31 }
  0xdb   : > { %v823_v43 = vpop.permute.xlu1 %822  ;;  %v906_v51 = vadd.f32 %v1787_v47, %v794_v42  ;;  %v1761_v47 = vsel %vm640_vm6, 1.0, %v2481_v7 }
  0xdc   : > { %vm857_vm8 = vcmp.eq.s32.totalorder %v2762_v3, %v823_v43 }
  0xdd   : > { %v1786_v48 = vsel %vm857_vm8, 1.0, %v2481_v7  ;;  %2256 = vmatpush3.bf16.msra.mxu1 %v2253_v31  ;;  %v1791_v31 = vsel %vm862_vm3, 1.0, %v2481_v7 }
  0xde   : > { %v905_v49 = vadd.f32 %v1786_v48, %v793_v46  ;;  %2258 = vmatprep.subr.bf16.mxu1 %v2257_v39  ;;  %v844_v48 = vpop.permute.xlu0 %843 }
  0xdf   : > { %vm864_vm9 = vcmp.eq.s32.totalorder %v2762_v3, %v844_v48  ;;  %v1454_v48 = vld [vmem:[%s3197_s6] sm:$0xff] }
  0xe0   : > { %v605_v54 = vpop.permute.xlu1 %604  ;;  %2014 = vmatprep.mubr.f32.mxu1 %v905_v49  ;;  %v1793_v53 = vsel %vm864_vm9, 1.0, %v2481_v7 }
  0xe1   : > { %2015 = vmatmul.mubr.f32.gmra.mrb[6].mxu1 %v906_v51  ;;  %vm635_vm12 = vcmp.eq.s32.totalorder %v2762_v3, %v605_v54 }
  0xe2   : > { %2260 = vmatpush3.bf16.msra.mxu1 %v2257_v39  ;;  %v1756_v63 = vsel %vm635_vm12, 1.0, %v2481_v7  ;;  %vm642_vm12 = vcmp.eq.s32.totalorder %v2762_v3, %v2783_v24 }
  0xe5   : > { %v717_v56 = vpop.permute.xlu1 %716 }
  0xe6   : > { %vm747_vm10 = vcmp.eq.s32.totalorder %v2762_v3, %v717_v56 }
  0xe7   : > { %v1772_v61 = vsel %vm747_vm10, 1.0, %v2481_v7 }
  0xe8   : > { %v795_v2 = vadd.f32 %v1772_v61, %v1756_v63 }
  0xe9   : > { %v720_v57 = vpop.permute.xlu1 %719 }
  0xea   : > { %vm748_vm11 = vcmp.eq.s32.totalorder %v2762_v3, %v720_v57  ;;  %v2984_v57 = vshrl.u32 %v347_v62, 7  ;;  %v850_v62 = vpop.permute.xlu0 %849 }
  0xeb   : > { %v1773_v60 = vsel %vm748_vm11, 1.0, %v2481_v7 }
  0xec   : > { %v796_v18 = vadd.f32 %v1773_v60, %v1757_v59  ;;  %v349_v59 = vsub.s32 0, %v2984_v57  ;;  %v2990_v60 = vld [vmem:[%s3198_s7] sm:$0xf] }
  0xee   : > { %v829_v0 = vpop.permute.xlu1 %828  ;;  %v908_v9 = vadd.f32 %v1789_v4, %v796_v18  ;;  %v2925_v12 = vpop.f32.mrb[0].mxu0  ;;  %v2994_v63 = vrot.slane %v2990_v60, %v349_v59 }
  0xef   : > { %vm859_vm14 = vcmp.eq.s32.totalorder %v2762_v3, %v829_v0  ;;  %v2927_v13 = vpop.f32.mrb[1].mxu0 }
  0xf0   : > { %v1788_v6 = vsel %vm859_vm14, 1.0, %v2481_v7  ;;  %v467_v4 = vadd.f32 %v2927_v13, %v2994_v63  ;;  %v472_v13 = vadd.f32 %v2925_v12, %v2994_v63 }
  0xf1   : > { %v907_v8 = vadd.f32 %v1788_v6, %v795_v2  ;;  %v1763_v2 = vsel %vm642_vm12, 1.0, %v2481_v7 }
  0xf2   : > { %v2929_v1 = vpop.f32.mrb[2].mxu0 }
  0xf3   : > { %v611_v11 = vpop.permute.xlu1 %610  ;;  %2017 = vmatprep.mubr.f32.mxu1 %v907_v8  ;;  %v2931_v15 = vpop.f32.mrb[3].mxu0 }
  0xf4   : > { %2018 = vmatmul.mubr.f32.gmra.mrb[8].mxu1 %v908_v9  ;;  %vm637_vm2 = vcmp.eq.s32.totalorder %v2762_v3, %v611_v11 }
  0xf5   : > { %v1758_v28 = vsel %vm637_vm2, 1.0, %v2481_v7 }
  0xf7   : > { %v2933_v17 = vpop.f32.mrb[4].mxu0 }
  0xf8   : > { %v723_v14 = vpop.permute.xlu1 %722  ;;  %v2936_v21 = vpop.f32.mrb[5].mxu0  ;;  %v492_v12 = vadd.f32 %v2933_v17, %v2994_v63 }
  0xf9   : > { %vm749_vm15 = vcmp.eq.s32.totalorder %v2762_v3, %v723_v14 }
  0xfa   : > { %v1774_v10 = vsel %vm749_vm15, 1.0, %v2481_v7  ;;  %vm866_vm15 = vcmp.eq.s32.totalorder %v2762_v3, %v850_v62 }
  0xfb   : > { %v2945_v25 = vpop.f32.mrb[6].mxu0  ;;  %v797_v30 = vadd.f32 %v1774_v10, %v1758_v28  ;;  %v1795_v14 = vsel %vm866_vm15, 1.0, %v2481_v7  ;;  %v546_v28 = vmax.f32 %v472_v13, 0.0 }
  0xfc   : > { %v726_v19 = vpop.permute.xlu1 %725  ;;  %v2948_v27 = vpop.f32.mrb[7].mxu0 }
  0xfd   : > { %vm750_vm1 = vcmp.eq.s32.totalorder %v2762_v3, %v726_v19  ;;  %v545_v19 = vmax.f32 %v467_v4, 0.0  ;;  %v1459_v4 = vld [vmem:[%s3197_s6 + $0x28] sm:$0xff] }
  0xfe   : > { %v1775_v23 = vsel %vm750_vm1, 1.0, %v2481_v7 }
  0xff   : > { %v798_v29 = vadd.f32 %v1775_v23, %v1759_v26  ;;  %v2954_v33 = vpop.f32.mrb[8].mxu0  ;;  %v477_v23 = vadd.f32 %v2931_v15, %v2994_v63  ;;  %v497_v15 = vadd.f32 %v2948_v27, %v2994_v63 }
 0x100   : > { %v2956_v34 = vpop.f32.mrb[9].mxu0  ;;  %v512_v17 = vadd.f32 %v2954_v33, %v2994_v63 }
 0x101   : > { %v835_v20 = vpop.permute.xlu1 %834  ;;  %v910_v35 = vadd.f32 %v1791_v31, %v798_v29  ;;  %v547_v26 = vmax.f32 %v477_v23, 0.0  ;;  %v550_v31 = vmax.f32 %v492_v12, 0.0  ;;  %v1461_v23 = vld [vmem:[%s3197_s6 + $0x38] sm:$0xff] }
 0x102   : > { %vm861_vm4 = vcmp.eq.s32.totalorder %v2762_v3, %v835_v20 }
 0x103   : > { %v1790_v32 = vsel %vm861_vm4, 1.0, %v2481_v7  ;;  %v2958_v37 = vpop.f32.mrb[10].mxu0 }
 0x104   : > { %v909_v5 = vadd.f32 %v1790_v32, %v797_v30  ;;  %v2960_v38 = vpop.f32.mrb[11].mxu0  ;;  %v551_v30 = vmax.f32 %v497_v15, 0.0  ;;  %v1462_v15 = vld [vmem:[%s3197_s6 + $0x40] sm:$0xff] }
 0x105   : > { %v517_v27 = vadd.f32 %v2960_v38, %v2994_v63 }
 0x106   : > { %v617_v36 = vpop.permute.xlu1 %616  ;;  %2020 = vmatprep.mubr.f32.mxu1 %v909_v5 }
 0x107   : > { %2021 = vmatmul.mubr.f32.gmra.mrb[10].mxu1 %v910_v35  ;;  %v2962_v40 = vpop.f32.mrb[12].mxu0  ;;  %vm639_vm8 = vcmp.eq.s32.totalorder %v2762_v3, %v617_v36  ;;  %v555_v35 = vmax.f32 %v517_v27, 0.0  ;;  %v554_v36 = vmax.f32 %v512_v17, 0.0  ;;  %v1465_v17 = vld [vmem:[%s3197_s6 + $0x58] sm:$0xff] }
 0x108   : > { %v2964_v41 = vpop.f32.mrb[13].mxu0  ;;  %v1760_v49 = vsel %vm639_vm8, 1.0, %v2481_v7  ;;  %v532_v33 = vadd.f32 %v2962_v40, %v2994_v63 }
 0x10b   : > { %v729_v39 = vpop.permute.xlu1 %728  ;;  %v2967_v43 = vpop.f32.mrb[14].mxu0 }
 0x10c   : > { %vm751_vm5 = vcmp.eq.s32.totalorder %v2762_v3, %v729_v39  ;;  %v2972_v44 = vpop.f32.mrb[15].mxu0 }
 0x10d   : > { %v1776_v46 = vsel %vm751_vm5, 1.0, %v2481_v7  ;;  %v537_v38 = vadd.f32 %v2972_v44, %v2994_v63  ;;  %v1288_v44 = vld [vmem:[%s3196_s5 + $0x78] sm:$0xff] }
 0x10e   : > { %v799_v22 = vadd.f32 %v1776_v46, %v1760_v49  ;;  %v558_v46 = vmax.f32 %v532_v33, 0.0  ;;  %v1466_v33 = vld [vmem:[%s3197_s6 + $0x60] sm:$0xff] }
 0x10f   : > { %v732_v42 = vpop.permute.xlu1 %731 }
 0x110   : > { %vm752_vm7 = vcmp.eq.s32.totalorder %v2762_v3, %v732_v42 }
 0x111   : > { %v1777_v45 = vsel %vm752_vm7, 1.0, %v2481_v7 }
 0x112   : > { %v800_v50 = vadd.f32 %v1777_v45, %v1761_v47  ;;  %v559_v45 = vmax.f32 %v537_v38, 0.0  ;;  %v1287_v47 = vld [vmem:[%s3196_s5 + $0x70] sm:$0xff] }
 0x113   : > { %v2289_v40 = vpack.c.bf16 %v1288_v44, %v1287_v47 }
 0x114   : > { %v841_v51 = vpop.permute.xlu1 %840  ;;  %v912_v55 = vadd.f32 %v1793_v53, %v800_v50  ;;  %v1239_v50 = vsub.s32 1, %v2984_v57 }
 0x115   : > { %vm863_vm10 = vcmp.eq.s32.totalorder %v2762_v3, %v841_v51  ;;  %2290 = vmatprep.subr.bf16.mxu0 %v2289_v40 }
 0x116   : > { %v1792_v52 = vsel %vm863_vm10, 1.0, %v2481_v7  ;;  %2292 = vmatpush3.bf16.msra.mxu0 %v2289_v40  ;;  %v3054_v51 = vrot.slane %v2990_v60, %v1239_v50 }
 0x117   : > { %v911_v54 = vadd.f32 %v1792_v52, %v799_v22 }
 0x119   : > { %v623_v56 = vpop.permute.xlu1 %622  ;;  %2023 = vmatprep.mubr.f32.mxu1 %v911_v54 }
 0x11a   : > { %2024 = vmatmul.mubr.f32.gmra.mrb[12].mxu1 %v912_v55  ;;  %vm641_vm14 = vcmp.eq.s32.totalorder %v2762_v3, %v623_v56  ;;  %v1456_v55 = vld [vmem:[%s3197_s6 + $0x10] sm:$0xff]  ;;  %v1457_v56 = vld [vmem:[%s3197_s6 + $0x18] sm:$0xff] }
 0x11b   : > { %v1762_v6 = vsel %vm641_vm14, 1.0, %v2481_v7 }
 0x11e   : > { %v735_v58 = vpop.permute.xlu1 %734 }
 0x11f   : > { %vm753_vm11 = vcmp.eq.s32.totalorder %v2762_v3, %v735_v58 }
 0x120   : > { %v1778_v0 = vsel %vm753_vm11, 1.0, %v2481_v7 }
 0x121   : > { %v801_v9 = vadd.f32 %v1778_v0, %v1762_v6 }
 0x122   : > { %v738_v61 = vpop.permute.xlu1 %737 }
 0x123   : > { %vm754_vm13 = vcmp.eq.s32.totalorder %v2762_v3, %v738_v61 }
 0x124   : > { %v1779_v18 = vsel %vm754_vm13, 1.0, %v2481_v7 }
 0x125   : > { %v802_v8 = vadd.f32 %v1779_v18, %v1763_v2  ;;  %v2297_v18 = vpack.c.bf16 %v1457_v56, %v1456_v55  ;;  %v1458_v2 = vld [vmem:[%s3197_s6 + $0x20] sm:$0xff]  ;;  %v1468_v56 = vld [vmem:[%s3197_s6 + $0x70] sm:$0xff] }
 0x127   : > { %v847_v24 = vpop.permute.xlu1 %846  ;;  %v914_v10 = vadd.f32 %v1795_v14, %v802_v8  ;;  %v2301_v14 = vpack.c.bf16 %v1459_v4, %v1458_v2 }
 0x128   : > { %vm865_vm0 = vcmp.eq.s32.totalorder %v2762_v3, %v847_v24  ;;  %v487_v3 = vadd.f32 %v2936_v21, %v2994_v63  ;;  %v507_v21 = vadd.f32 %v2956_v34, %v2994_v63  ;;  %v527_v34 = vadd.f32 %v2964_v41, %v2994_v63 }
 0x129   : > { %v1794_v11 = vsel %vm865_vm0, 1.0, %v2481_v7  ;;  %v482_v7 = vadd.f32 %v2929_v1, %v2994_v63  ;;  %v502_v1 = vadd.f32 %v2945_v25, %v2994_v63  ;;  %v522_v25 = vadd.f32 %v2958_v37, %v2994_v63 }
 0x12a   : > { %v913_v16 = vadd.f32 %v1794_v11, %v801_v9  ;;  %v549_v29 = vmax.f32 %v487_v3, 0.0  ;;  %v553_v32 = vmax.f32 %v507_v21, 0.0  ;;  %v557_v39 = vmax.f32 %v527_v34, 0.0 }
 0x12b   : > { %v548_v20 = vmax.f32 %v482_v7, 0.0  ;;  %v552_v5 = vmax.f32 %v502_v1, 0.0  ;;  %v556_v42 = vmax.f32 %v522_v25, 0.0  ;;  %v542_v41 = vadd.f32 %v2967_v43, %v2994_v63  ;;  %v1455_v43 = vld [vmem:[%s3197_s6 + $0x8] sm:$0xff] }
 0x12c   : > { %2026 = vmatprep.mubr.f32.mxu1 %v913_v16  ;;  %v2293_v49 = vpack.c.bf16 %v1455_v43, %v1454_v48 }
 0x12d   : > { %2027 = vmatmul.mubr.f32.gmra.mrb[14].mxu1 %v914_v10  ;;  %v560_v37 = vmax.f32 %v542_v41, 0.0 }
 0x12e   : > { %2061 = vmatprep.mubr.f32.mxu1 %v545_v19  ;;  %2294 = vmatprep.subr.bf16.mxu0 %v2293_v49  ;;  %v1460_v19 = vld [vmem:[%s3197_s6 + $0x30] sm:$0xff] }
 0x12f   : > { %v2305_v7 = vpack.c.bf16 %v1461_v23, %v1460_v19 }
 0x131   : > { %2062 = vmatmul.mubr.f32.vlgmr.msra.gmra.mrb[0].mxu1 %v546_v28 }
 0x132   : > { %2064 = vmatprep.mubr.f32.mxu1 %v547_v26 }
 0x135   : > { %2065 = vmatmul.mubr.f32.gmra.mrb[2].mxu1 %v548_v20  ;;  %v1463_v20 = vld [vmem:[%s3197_s6 + $0x48] sm:$0xff] }
 0x136   : > { %2067 = vmatprep.mubr.f32.mxu1 %v549_v29 }
 0x139   : > { %2068 = vmatmul.mubr.f32.gmra.mrb[4].mxu1 %v550_v31 }
 0x13a   : > { %2070 = vmatprep.mubr.f32.mxu1 %v551_v30 }
 0x13d   : > { %2071 = vmatmul.mubr.f32.gmra.mrb[6].mxu1 %v552_v5  ;;  %v1464_v5 = vld [vmem:[%s3197_s6 + $0x50] sm:$0xff] }
 0x13e   : > { %2073 = vmatprep.mubr.f32.mxu1 %v553_v32  ;;  %v2309_v32 = vpack.c.bf16 %v1463_v20, %v1462_v15  ;;  %v2313_v38 = vpack.c.bf16 %v1465_v17, %v1464_v5 }
 0x141   : > { %2074 = vmatmul.mubr.f32.gmra.mrb[8].mxu1 %v554_v36 }
 0x142   : > { %2076 = vmatprep.mubr.f32.mxu1 %v555_v35 }
 0x145   : > { %2077 = vmatmul.mubr.f32.gmra.mrb[10].mxu1 %v556_v42 }
 0x146   : > { %2079 = vmatprep.mubr.f32.mxu1 %v557_v39 }
 0x149   : > { %2080 = vmatmul.mubr.f32.gmra.mrb[12].mxu1 %v558_v46 }
 0x14a   : > { %2082 = vmatprep.mubr.f32.mxu1 %v559_v45  ;;  %v1467_v45 = vld [vmem:[%s3197_s6 + $0x68] sm:$0xff] }
 0x14b   : > { %v2317_v40 = vpack.c.bf16 %v1467_v45, %v1466_v33 }
 0x14d   : > { %2083 = vmatmul.mubr.f32.gmra.mrb[14].mxu1 %v560_v37 }
 0x204   : > { %v2063_v22 = vpop.f32.mrb[0].mxu1 }
 0x205   : > { %v1242_v52 = vadd.f32 %v2063_v22, %v3054_v51  ;;  %v1158_v53 = vpop.f32.mrb[1].mxu1 }
 0x206   : > { %v1241_v54 = vadd.f32 %v3054_v51, %v1158_v53 }
 0x207   : > { %v1258_v61 = vmax.f32 %v1242_v52, 0.0 }
 0x208   : > { %v1257_v58 = vmax.f32 %v1241_v54, 0.0  ;;  %v2066_v59 = vpop.f32.mrb[2].mxu1 }
 0x209   : > { %v1244_v63 = vadd.f32 %v2066_v59, %v3054_v51  ;;  %v1168_v62 = vpop.f32.mrb[3].mxu1 }
 0x20a   : > { %v1243_v0 = vadd.f32 %v3054_v51, %v1168_v62  ;;  %2117 = vmatprep.mubr.f32.mxu0 %v1257_v58  ;;  %v1469_v58 = vld [vmem:[%s3197_s6 + $0x78] sm:$0xff] }
 0x20b   : > { %2118 = vmatmul.mubr.f32.vlgmr.msra.gmra.mrb[16].mxu0 %v1258_v61  ;;  %v1260_v24 = vmax.f32 %v1244_v63, 0.0  ;;  %v2321_v59 = vpack.c.bf16 %v1469_v58, %v1468_v56 }
 0x20c   : > { %v1259_v6 = vmax.f32 %v1243_v0, 0.0  ;;  %v2069_v8 = vpop.f32.mrb[4].mxu1  ;;  %2296 = vmatpush3.bf16.msra.mxu0 %v2293_v49 }
 0x20d   : > { %v1246_v9 = vadd.f32 %v2069_v8, %v3054_v51  ;;  %v1178_v11 = vpop.f32.mrb[5].mxu1  ;;  %2298 = vmatprep.subr.bf16.mxu0 %v2297_v18 }
 0x20e   : > { %v1245_v16 = vadd.f32 %v3054_v51, %v1178_v11  ;;  %2120 = vmatprep.mubr.f32.mxu0 %v1259_v6 }
 0x20f   : > { %2121 = vmatmul.mubr.f32.gmra.mrb[18].mxu0 %v1260_v24  ;;  %v1262_v26 = vmax.f32 %v1246_v9, 0.0 }
 0x210   : > { %v1261_v13 = vmax.f32 %v1245_v16, 0.0  ;;  %v2072_v10 = vpop.f32.mrb[6].mxu1  ;;  %2300 = vmatpush3.bf16.msra.mxu0 %v2297_v18 }
 0x211   : > { %v1248_v3 = vadd.f32 %v2072_v10, %v3054_v51  ;;  %v1188_v28 = vpop.f32.mrb[7].mxu1  ;;  %2302 = vmatprep.subr.bf16.mxu0 %v2301_v14 }
 0x212   : > { %v1247_v29 = vadd.f32 %v3054_v51, %v1188_v28  ;;  %2123 = vmatprep.mubr.f32.mxu0 %v1261_v13 }
 0x213   : > { %2124 = vmatmul.mubr.f32.gmra.mrb[20].mxu0 %v1262_v26  ;;  %v1264_v21 = vmax.f32 %v1248_v3, 0.0 }
 0x214   : > { %v1263_v12 = vmax.f32 %v1247_v29, 0.0  ;;  %v2075_v30 = vpop.f32.mrb[8].mxu1  ;;  %2304 = vmatpush3.bf16.msra.mxu0 %v2301_v14 }
 0x215   : > { %v1250_v31 = vadd.f32 %v2075_v30, %v3054_v51  ;;  %v1198_v1 = vpop.f32.mrb[9].mxu1  ;;  %2306 = vmatprep.subr.bf16.mxu0 %v2305_v7 }
 0x216   : > { %v1249_v27 = vadd.f32 %v3054_v51, %v1198_v1  ;;  %2126 = vmatprep.mubr.f32.mxu0 %v1263_v12 }
 0x217   : > { %2127 = vmatmul.mubr.f32.gmra.mrb[22].mxu0 %v1264_v21  ;;  %v1266_v36 = vmax.f32 %v1250_v31, 0.0 }
 0x218   : > { %v1265_v35 = vmax.f32 %v1249_v27, 0.0  ;;  %v2078_v34 = vpop.f32.mrb[10].mxu1  ;;  %2308 = vmatpush3.bf16.msra.mxu0 %v2305_v7 }
 0x219   : > { %v1252_v25 = vadd.f32 %v2078_v34, %v3054_v51  ;;  %v1208_v39 = vpop.f32.mrb[11].mxu1  ;;  %2310 = vmatprep.subr.bf16.mxu0 %v2309_v32 }
 0x21a   : > { %v1251_v42 = vadd.f32 %v3054_v51, %v1208_v39  ;;  %2129 = vmatprep.mubr.f32.mxu0 %v1265_v35 }
 0x21b   : > { %2130 = vmatmul.mubr.f32.gmra.mrb[24].mxu0 %v1266_v36  ;;  %v1268_v37 = vmax.f32 %v1252_v25, 0.0 }
 0x21c   : > { %v1267_v46 = vmax.f32 %v1251_v42, 0.0  ;;  %v2081_v41 = vpop.f32.mrb[12].mxu1  ;;  %2312 = vmatpush3.bf16.msra.mxu0 %v2309_v32 }
 0x21d   : > { %v1254_v47 = vadd.f32 %v2081_v41, %v3054_v51  ;;  %v1218_v44 = vpop.f32.mrb[13].mxu1  ;;  %2314 = vmatprep.subr.bf16.mxu0 %v2313_v38 }
 0x21e   : > { %v1253_v48 = vadd.f32 %v3054_v51, %v1218_v44  ;;  %2132 = vmatprep.mubr.f32.mxu0 %v1267_v46 }
 0x21f   : > { %2133 = vmatmul.mubr.f32.gmra.mrb[26].mxu0 %v1268_v37  ;;  %v1270_v50 = vmax.f32 %v1254_v47, 0.0 }
 0x220   : > { %v1269_v43 = vmax.f32 %v1253_v48, 0.0  ;;  %v2084_v49 = vpop.f32.mrb[14].mxu1  ;;  %2316 = vmatpush3.bf16.msra.mxu0 %v2313_v38  ;;  %v1472_v48 = vsub.s32 3, %v2984_v57 }
 0x221   : > { %v1256_v22 = vadd.f32 %v2084_v49, %v3054_v51  ;;  %v1228_v52 = vpop.f32.mrb[15].mxu1  ;;  %2318 = vmatprep.subr.bf16.mxu0 %v2317_v40 }
 0x222   : > { %v1255_v53 = vadd.f32 %v3054_v51, %v1228_v52  ;;  %2135 = vmatprep.mubr.f32.mxu0 %v1269_v43  ;;  %v1291_v51 = vsub.s32 2, %v2984_v57  ;;  %v1473_v43 = vrot.slane %v2990_v60, %v1472_v48 }
 0x223   : > { %2136 = vmatmul.mubr.f32.gmra.mrb[28].mxu0 %v1270_v50  ;;  %v1272_v55 = vmax.f32 %v1256_v22, 0.0 }
 0x224   : > { %v1271_v54 = vmax.f32 %v1255_v53, 0.0  ;;  %2320 = vmatpush3.bf16.msra.mxu0 %v2317_v40  ;;  %v1292_v61 = vrot.slane %v2990_v60, %v1291_v51 }
 0x225   : > { %2322 = vmatprep.subr.bf16.mxu0 %v2321_v59 }
 0x226   : > { %2138 = vmatprep.mubr.f32.mxu0 %v1271_v54 }
 0x227   : > { %2139 = vmatmul.mubr.f32.gmra.mrb[30].mxu0 %v1272_v55 }
 0x228   : > { %2324 = vmatpush3.bf16.msra.mxu0 %v2321_v59 }
 0x2de   : > { %v2119_v63 = vpop.f32.mrb[16].mxu0 }
 0x2df   : > { %v1365_v62 = vadd.f32 %v2119_v63, %v1292_v61  ;;  %v1359_v18 = vpop.f32.mrb[17].mxu0 }
 0x2e0   : > { %v1360_v0 = vadd.f32 %v1359_v18, %v1292_v61 }
 0x2e1   : > { %v1439_v6 = vmax.f32 %v1365_v62, 0.0 }
 0x2e2   : > { %v1438_v2 = vmax.f32 %v1360_v0, 0.0  ;;  %v2122_v4 = vpop.f32.mrb[18].mxu0 }
 0x2e3   : > { %v1375_v8 = vadd.f32 %v2122_v4, %v1292_v61  ;;  %v1369_v24 = vpop.f32.mrb[19].mxu0 }
 0x2e4   : > { %v1370_v9 = vadd.f32 %v1369_v24, %v1292_v61  ;;  %2173 = vmatprep.mubr.f32.mxu0 %v1438_v2 }
 0x2e5   : > { %2174 = vmatmul.mubr.f32.vlgmr.msra.gmra.mrb[32].mxu0 %v1439_v6  ;;  %v1441_v16 = vmax.f32 %v1375_v8, 0.0 }
 0x2e6   : > { %v1440_v11 = vmax.f32 %v1370_v9, 0.0  ;;  %v2125_v14 = vpop.f32.mrb[20].mxu0 }
 0x2e7   : > { %v1385_v19 = vadd.f32 %v2125_v14, %v1292_v61  ;;  %v1379_v23 = vpop.f32.mrb[21].mxu0 }
 0x2e8   : > { %v1380_v13 = vadd.f32 %v1379_v23, %v1292_v61  ;;  %2176 = vmatprep.mubr.f32.mxu0 %v1440_v11 }
 0x2e9   : > { %2177 = vmatmul.mubr.f32.gmra.mrb[34].mxu0 %v1441_v16  ;;  %v1443_v3 = vmax.f32 %v1385_v19, 0.0 }
 0x2ea   : > { %v1442_v10 = vmax.f32 %v1380_v13, 0.0  ;;  %v2128_v26 = vpop.f32.mrb[22].mxu0 }
 0x2eb   : > { %v1395_v28 = vadd.f32 %v2128_v26, %v1292_v61  ;;  %v1389_v7 = vpop.f32.mrb[23].mxu0 }
 0x2ec   : > { %v1390_v29 = vadd.f32 %v1389_v7, %v1292_v61  ;;  %2179 = vmatprep.mubr.f32.mxu0 %v1442_v10 }
 0x2ed   : > { %2180 = vmatmul.mubr.f32.gmra.mrb[36].mxu0 %v1443_v3  ;;  %v1445_v12 = vmax.f32 %v1395_v28, 0.0 }
 0x2ee   : > { %v1444_v15 = vmax.f32 %v1390_v29, 0.0  ;;  %v2131_v20 = vpop.f32.mrb[24].mxu0 }
 0x2ef   : > { %v1405_v30 = vadd.f32 %v2131_v20, %v1292_v61  ;;  %v1399_v21 = vpop.f32.mrb[25].mxu0 }
 0x2f0   : > { %v1400_v31 = vadd.f32 %v1399_v21, %v1292_v61  ;;  %2182 = vmatprep.mubr.f32.mxu0 %v1444_v15 }
 0x2f1   : > { %2183 = vmatmul.mubr.f32.gmra.mrb[38].mxu0 %v1445_v12  ;;  %v1447_v27 = vmax.f32 %v1405_v30, 0.0 }
 0x2f2   : > { %v1446_v1 = vmax.f32 %v1400_v31, 0.0  ;;  %v2134_v32 = vpop.f32.mrb[26].mxu0 }
 0x2f3   : > { %v1415_v5 = vadd.f32 %v2134_v32, %v1292_v61  ;;  %v1409_v17 = vpop.f32.mrb[27].mxu0 }
 0x2f4   : > { %v1410_v35 = vadd.f32 %v1409_v17, %v1292_v61  ;;  %2185 = vmatprep.mubr.f32.mxu0 %v1446_v1 }
 0x2f5   : > { %2186 = vmatmul.mubr.f32.gmra.mrb[40].mxu0 %v1447_v27  ;;  %v1449_v25 = vmax.f32 %v1415_v5, 0.0 }
 0x2f6   : > { %v1448_v34 = vmax.f32 %v1410_v35, 0.0  ;;  %v2137_v36 = vpop.f32.mrb[28].mxu0 }
 0x2f7   : > { %v1425_v39 = vadd.f32 %v2137_v36, %v1292_v61  ;;  %v1419_v38 = vpop.f32.mrb[29].mxu0 }
 0x2f8   : > { %v1420_v42 = vadd.f32 %v1419_v38, %v1292_v61  ;;  %2188 = vmatprep.mubr.f32.mxu0 %v1448_v34 }
 0x2f9   : > { %2189 = vmatmul.mubr.f32.gmra.mrb[42].mxu0 %v1449_v25  ;;  %v1451_v46 = vmax.f32 %v1425_v39, 0.0 }
 0x2fa   : > { %v1450_v33 = vmax.f32 %v1420_v42, 0.0  ;;  %v2140_v45 = vpop.f32.mrb[30].mxu0 }
 0x2fb   : > { %v1435_v41 = vadd.f32 %v2140_v45, %v1292_v61  ;;  %v1429_v37 = vpop.f32.mrb[31].mxu0 }
 0x2fc   : > { %v1430_v47 = vadd.f32 %v1429_v37, %v1292_v61  ;;  %2191 = vmatprep.mubr.f32.mxu0 %v1450_v33 }
 0x2fd   : > { %2192 = vmatmul.mubr.f32.gmra.mrb[44].mxu0 %v1451_v46  ;;  %v1453_v40 = vmax.f32 %v1435_v41, 0.0 }
 0x2fe   : > { %v1452_v44 = vmax.f32 %v1430_v47, 0.0 }
 0x300   : > { %2194 = vmatprep.mubr.f32.mxu0 %v1452_v44 }
 0x301   : > { %2195 = vmatmul.mubr.f32.gmra.mrb[46].mxu0 %v1453_v40 }
 0x3b8   : > { %v2175_v49 = vpop.f32.mrb[32].mxu0 }
 0x3b9   : > { %v1546_v50 = vadd.f32 %v2175_v49, %v1473_v43  ;;  %v1540_v22 = vpop.f32.mrb[33].mxu0 }
 0x3ba   : > { %v1541_v52 = vadd.f32 %v1540_v22, %v1473_v43 }
 0x3bb   : > { %1620 = vst [vmem:[%s3121_s20 + $0x8] sm:$0xff] %v1546_v50 }
 0x3bc   : > { %1619 = vst [vmem:[%s3121_s20] sm:$0xff] %v1541_v52  ;;  %v2178_v57 = vpop.f32.mrb[34].mxu0 }
 0x3bd   : > { %v1556_v53 = vadd.f32 %v2178_v57, %v1473_v43  ;;  %v1550_v54 = vpop.f32.mrb[35].mxu0 }
 0x3be   : > { %v1551_v60 = vadd.f32 %v1550_v54, %v1473_v43 }
 0x3bf   : > { %1622 = vst [vmem:[%s3121_s20 + $0x18] sm:$0xff] %v1556_v53 }
 0x3c0   : > { %1621 = vst [vmem:[%s3121_s20 + $0x10] sm:$0xff] %v1551_v60  ;;  %v2181_v55 = vpop.f32.mrb[36].mxu0 }
 0x3c1   : > { %v1566_v56 = vadd.f32 %v2181_v55, %v1473_v43  ;;  %v1560_v58 = vpop.f32.mrb[37].mxu0 }
 0x3c2   : > { %v1561_v59 = vadd.f32 %v1560_v58, %v1473_v43 }
 0x3c3   : > { %1624 = vst [vmem:[%s3121_s20 + $0x28] sm:$0xff] %v1566_v56 }
 0x3c4   : > { %1623 = vst [vmem:[%s3121_s20 + $0x20] sm:$0xff] %v1561_v59  ;;  %v2184_v51 = vpop.f32.mrb[38].mxu0 }
 0x3c5   : > { %v1576_v61 = vadd.f32 %v2184_v51, %v1473_v43  ;;  %v1570_v63 = vpop.f32.mrb[39].mxu0 }
 0x3c6   : > { %v1571_v62 = vadd.f32 %v1570_v63, %v1473_v43 }
 0x3c7   : > { %1626 = vst [vmem:[%s3121_s20 + $0x38] sm:$0xff] %v1576_v61 }
 0x3c8   : > { %1625 = vst [vmem:[%s3121_s20 + $0x30] sm:$0xff] %v1571_v62  ;;  %v2187_v18 = vpop.f32.mrb[40].mxu0 }
 0x3c9   : > { %v1586_v0 = vadd.f32 %v2187_v18, %v1473_v43  ;;  %v1580_v2 = vpop.f32.mrb[41].mxu0 }
 0x3ca   : > { %v1581_v4 = vadd.f32 %v1580_v2, %v1473_v43 }
 0x3cb   : > { %1628 = vst [vmem:[%s3121_s20 + $0x48] sm:$0xff] %v1586_v0 }
 0x3cc   : > { %1627 = vst [vmem:[%s3121_s20 + $0x40] sm:$0xff] %v1581_v4  ;;  %v2190_v6 = vpop.f32.mrb[42].mxu0 }
 0x3cd   : > { %v1596_v8 = vadd.f32 %v2190_v6, %v1473_v43  ;;  %v1590_v24 = vpop.f32.mrb[43].mxu0 }
 0x3ce   : > { %v1591_v9 = vadd.f32 %v1590_v24, %v1473_v43 }
 0x3cf   : > { %1630 = vst [vmem:[%s3121_s20 + $0x58] sm:$0xff] %v1596_v8 }
 0x3d0   : > { %1629 = vst [vmem:[%s3121_s20 + $0x50] sm:$0xff] %v1591_v9  ;;  %v2193_v11 = vpop.f32.mrb[44].mxu0 }
 0x3d1   : > { %v1606_v14 = vadd.f32 %v2193_v11, %v1473_v43  ;;  %v1600_v16 = vpop.f32.mrb[45].mxu0 }
 0x3d2   : > { %v1601_v19 = vadd.f32 %v1600_v16, %v1473_v43 }
 0x3d3   : > { %1632 = vst [vmem:[%s3121_s20 + $0x68] sm:$0xff] %v1606_v14 }
 0x3d4   : > { %1631 = vst [vmem:[%s3121_s20 + $0x60] sm:$0xff] %v1601_v19  ;;  %v2196_v23 = vpop.f32.mrb[46].mxu0 }
 0x3d5   : > { %v1616_v13 = vadd.f32 %v2196_v23, %v1473_v43  ;;  %v1610_v10 = vpop.f32.mrb[47].mxu0 }
 0x3d6   : > { %v1611_v26 = vadd.f32 %v1610_v10, %v1473_v43 }
 0x3d7   : > { %1634 = vst [vmem:[%s3121_s20 + $0x78] sm:$0xff] %v1616_v13 }
 0x3d8   : > { %1633 = vst [vmem:[%s3121_s20 + $0x70] sm:$0xff] %v1611_v26 }
 0x3d9   : > { %2427 = shalt.err (!%p2424_p3)
}
 0x3da   : > { %s2428_s17 = scalar_lea.hbm %s3142_s25, 2048  ;;  %s2432_s20 = scalar_lea.hbm %s3199_s8, 4096 }
 0x3db   : > { %p2429_p4 = scmp.ne.s32.totalorder %s3142_s25, %s2428_s17  ;;  %p2433_p9 = scmp.lt.u32.totalorder %s3142_s25, %s3199_s8 }
 0x3dc   : > { %p2434_p10 = scmp.lt.u32.totalorder %s2432_s20, %s2428_s17  ;;  %p2436_p12 = scmp.lt.u32.totalorder %s2428_s17, %s3142_s25 }
 0x3dd   : > { %p2430_p7 = pnand %p2429_p4, %p2568_p5 }
 0x3de   : > { %p2435_p11 = por %p2434_p10, %p2433_p9 }
 0x3df   : > { %p2431_p8 = pneg %p2430_p7 }
 0x3e0   : > { %p2437_p13 = por %p2436_p12, %p2435_p11 }
 0x3e2   : > { %p2438_p0 = pnand %p2437_p13, %p2431_p8 }
 0x3e4   : > { %2441 = shalt.err (!%p2438_p0)
}
 0x3e5   : > { %s2483_s24 = smov 128   ;;  %s2484_s10 = smov 8  }
 0x3e6   : > { %2341 = dma.vmem_to_hbm [thread:$0]  (%p2568_p5), %s3144_s21, 2048, %s3142_s25, %s3150_s9, %s2483_s24, %s2483_s24, %s2484_s10  }
 0x3e7 PF: > { %p2347_p1 = scmp.ge.s32.totalorder %s2476_s30, 2  ;;  %s1664_s12 = sand.u32 1, %s2464_s27  }
 0x3e8   : > { %s1665_s23 = scalar_lea.sflag [#allocation3], %s1664_s12 }
 0x3e9   : > { %p2344_p2 = pnand %p2347_p1, %p2572_p6 }
 0x3eb   : > { %2459 = dma.done.wait (!%p2344_p2), %s1665_s23, 2048  }
 0x3ec   : > { %2461 = vsyncadd (!%p2344_p2), %s1665_s23, 4294965248  ;;  %p18_p3 = scmp.ge.s32.totalorder %s2555_s11, 4   ;;  %s3202_s27 = smov %s2468_s28 }
 0x3ed   : > { %s3203_s28 = smov %s2472_s29  ;;  %s3204_s29 = smov %s2566_s14 }
 0x3ee   : > { %s3205_s30 = smov %s2555_s11  ;;  %20 = sbr.rel (!%p18_p3) target bundleno = 3 (0x3), region = 90 }
 0x3f5   :  { %1670 = vsyncpa [#allocation3], 1 }
 0x3f6   :  { %1672 = vsyncpa [#allocation3 + $0x1], 1 }

</bundles_post_ra>
